<compile_context>
chip_gen: v7x
topology: tpu7x:2x2x1
jax: 0.10.0
libtpu: 0.0.40
codegen_flags: <defaults>
</compile_context>

<pallas_src>
import math
from functools import lru_cache

import jax
import jax.numpy as jnp
from jax import lax
from jax.experimental import pallas as pl
from jax.experimental.pallas import tpu as pltpu


def silu(x):
    return x * jax.nn.sigmoid(x)


# ============================================================================
# Pallas kernel 1: fused [GroupNorm + SiLU] -> kxk stride-1 conv (in-VMEM
# im2col, one deep-K MXU matmul) -> [+ per-sample cond] [+ residual/shortcut].
# One grid step per sample; grid axis is "parallel".
# ============================================================================

@lru_cache(maxsize=None)
def _make_conv_kernel(H, W, Cin, Cout, kh, kw, pad, eps,
                      with_gn, with_silu, with_cond, with_res):
    Hp, Wp = H + 2 * pad, W + 2 * pad
    Ho, Wo = Hp - kh + 1, Wp - kw + 1
    use_mask = with_gn and pad > 0

    def kernel(*refs):
        it = iter(refs)
        x_ref = next(it)
        if with_gn:
            g_ref, beta_ref, gmat_ref = next(it), next(it), next(it)
        if use_mask:
            mask_ref = next(it)
        w_ref, bias_ref = next(it), next(it)
        if with_cond:
            cond_ref = next(it)
        if with_res:
            rx_ref, wsc_ref, bsc_ref = next(it), next(it), next(it)
        o_ref = next(it)

        y = x_ref[0].astype(jnp.float32)                       # (Hp, Wp, Cin)
        if with_gn:
            xi = y[pad:pad + H, pad:pad + W, :].reshape(H * W, Cin)
            s1 = jnp.mean(xi, axis=0, keepdims=True)            # (1, Cin)
            s2 = jnp.mean(xi * xi, axis=0, keepdims=True)
            gmat = gmat_ref[...]                                 # (Cin, Cin)
            mu = jnp.dot(s1, gmat, preferred_element_type=jnp.float32)
            m2 = jnp.dot(s2, gmat, preferred_element_type=jnp.float32)
            inv = lax.rsqrt(m2 - mu * mu + eps)
            y = (y - mu) * inv * g_ref[...] + beta_ref[...]
        if with_silu:
            y = y * jax.nn.sigmoid(y)                            # fp32 (v5e)
        if use_mask:
            y = y * mask_ref[...]                                # zero pad ring
        xb = y.astype(jnp.bfloat16)

        # In-VMEM im2col: K = kh*kw*Cin, one deep matmul on the MXU.
        cols = [xb[i:i + Ho, j:j + Wo, :].reshape(Ho * Wo, Cin)
                for i in range(kh) for j in range(kw)]
        a = cols[0] if len(cols) == 1 else jnp.concatenate(cols, axis=-1)
        acc = jnp.dot(a, w_ref[...], preferred_element_type=jnp.float32)
        acc = acc + bias_ref[...]
        if with_cond:
            acc = acc + cond_ref[0]                              # (1, Cout)
        if with_res:
            rx = rx_ref[0].reshape(Ho * Wo, rx_ref.shape[-1])
            acc = acc + jnp.dot(rx, wsc_ref[...],
                                preferred_element_type=jnp.float32)
            acc = acc + bsc_ref[...]
        o_ref[0] = acc.reshape(Ho, Wo, Cout).astype(o_ref.dtype)

    return kernel


def fused_conv(x, w, b, *, kh, kw, pad, gn=None, silu_act=False, cond=None,
               residual=None, out_dtype=jnp.bfloat16, eps=1e-5):
    """x: (N, H, W, Cin) bf16; w: (kh*kw*Cin, Cout) bf16; b: (1, Cout) f32."""
    N, H, W_, Cin = x.shape
    K, Cout = w.shape
    assert K == kh * kw * Cin
    Hp, Wp = H + 2 * pad, W_ + 2 * pad
    Ho, Wo = Hp - kh + 1, Wp - kw + 1

    xin = x if pad == 0 else jnp.pad(x, ((0, 0), (pad, pad), (pad, pad), (0, 0)))

    inputs = [xin]
    in_specs = [pl.BlockSpec((1, Hp, Wp, Cin), lambda n: (n, 0, 0, 0))]
    if gn is not None:
        inputs += [gn["g"], gn["b"], gn["gmat"]]
        in_specs += [pl.BlockSpec((1, Cin), lambda n: (0, 0)),
                     pl.BlockSpec((1, Cin), lambda n: (0, 0)),
                     pl.BlockSpec((Cin, Cin), lambda n: (0, 0))]
        if pad > 0:
            mask = jnp.pad(jnp.ones((H, W_, 1), jnp.float32),
                           ((pad, pad), (pad, pad), (0, 0)))
            inputs.append(mask)
            in_specs.append(pl.BlockSpec((Hp, Wp, 1), lambda n: (0, 0, 0)))
    inputs += [w, b]
    in_specs += [pl.BlockSpec((K, Cout), lambda n: (0, 0)),
                 pl.BlockSpec((1, Cout), lambda n: (0, 0))]
    if cond is not None:
        inputs.append(cond.reshape(N, 1, Cout).astype(jnp.float32))
        in_specs.append(pl.BlockSpec((1, 1, Cout), lambda n: (n, 0, 0)))
    if residual is not None:
        rx, wsc, bsc = residual
        rcin = rx.shape[-1]
        inputs += [rx, wsc, bsc]
        in_specs += [pl.BlockSpec((1, Ho, Wo, rcin), lambda n: (n, 0, 0, 0)),
                     pl.BlockSpec((rcin, Cout), lambda n: (0, 0)),
                     pl.BlockSpec((1, Cout), lambda n: (0, 0))]

    kernel = _make_conv_kernel(H, W_, Cin, Cout, kh, kw, pad, eps,
                               gn is not None, silu_act, cond is not None,
                               residual is not None)
    return pl.pallas_call(
        kernel,
        out_shape=jax.ShapeDtypeStruct((N, Ho, Wo, Cout), out_dtype),
        grid=(N,),
        in_specs=in_specs,
        out_specs=pl.BlockSpec((1, Ho, Wo, Cout), lambda n: (n, 0, 0, 0)),
        compiler_params=pltpu.CompilerParams(
            dimension_semantics=("parallel",)),
    )(*inputs)


# ============================================================================
# Pallas kernel 2: fused attention block: GroupNorm + packed QKV matmul +
# per-head softmax attention + output projection + residual.  One step/sample.
# ============================================================================

@lru_cache(maxsize=None)
def _make_attn_kernel(S, C, n_heads, d_k, eps, scale):
    def kernel(x_ref, g_ref, beta_ref, gmat_ref, wqkv_ref, bqkv_ref,
               wout_ref, bout_ref, o_ref):
        x = x_ref[0].astype(jnp.float32)                       # (S, C)
        s1 = jnp.mean(x, axis=0, keepdims=True)
        s2 = jnp.mean(x * x, axis=0, keepdims=True)
        gmat = gmat_ref[...]
        mu = jnp.dot(s1, gmat, preferred_element_type=jnp.float32)
        m2 = jnp.dot(s2, gmat, preferred_element_type=jnp.float32)
        inv = lax.rsqrt(m2 - mu * mu + eps)
        xn = ((x - mu) * inv * g_ref[...] + beta_ref[...]).astype(jnp.bfloat16)
        qkv = jnp.dot(xn, wqkv_ref[...], preferred_element_type=jnp.float32)
        qkv = (qkv + bqkv_ref[...]).astype(jnp.bfloat16)       # (S, 3C)
        wout = wout_ref[...]                                    # (C, C) bf16
        acc = jnp.zeros((S, C), jnp.float32)
        for h in range(n_heads):
            q = qkv[:, h * d_k:(h + 1) * d_k]
            k = qkv[:, C + h * d_k:C + (h + 1) * d_k]
            v = qkv[:, 2 * C + h * d_k:2 * C + (h + 1) * d_k]
            s = lax.dot_general(q, k, (((1,), (1,)), ((), ())),
                                preferred_element_type=jnp.float32) * scale
            m = jnp.max(s, axis=-1, keepdims=True)
            p = jnp.exp(s - m)                                  # fp32 softmax
            p = p * pl.reciprocal(jnp.sum(p, axis=-1, keepdims=True),
                                  approx=True)
            # Fold this head's slice of the output projection into the PV
            # matmul: MXU N = C lanes, no per-head concat / narrow stores.
            vw = jnp.dot(v, wout[h * d_k:(h + 1) * d_k, :],
                         preferred_element_type=jnp.float32).astype(jnp.bfloat16)
            acc = acc + jnp.dot(p.astype(jnp.bfloat16), vw,
                                preferred_element_type=jnp.float32)
        out = acc + bout_ref[...] + x                           # bias + residual
        o_ref[0] = out.astype(o_ref.dtype)

    return kernel


def fused_attention(x, p, eps=1e-5):
    N, H, W_, C = x.shape
    S = H * W_
    n_heads, d_k = p["n_heads"], p["d_k"]
    kernel = _make_attn_kernel(S, C, n_heads, d_k, eps, float(d_k) ** -0.5)
    out = pl.pallas_call(
        kernel,
        out_shape=jax.ShapeDtypeStruct((N, S, C), jnp.bfloat16),
        grid=(N,),
        in_specs=[
            pl.BlockSpec((1, S, C), lambda n: (n, 0, 0)),
            pl.BlockSpec((1, C), lambda n: (0, 0)),
            pl.BlockSpec((1, C), lambda n: (0, 0)),
            pl.BlockSpec((C, C), lambda n: (0, 0)),
            pl.BlockSpec((C, 3 * C), lambda n: (0, 0)),
            pl.BlockSpec((1, 3 * C), lambda n: (0, 0)),
            pl.BlockSpec((C, C), lambda n: (0, 0)),
            pl.BlockSpec((1, C), lambda n: (0, 0)),
        ],
        out_specs=pl.BlockSpec((1, S, C), lambda n: (n, 0, 0)),
        compiler_params=pltpu.CompilerParams(
            dimension_semantics=("parallel",)),
    )(x.reshape(N, S, C), p["g"], p["b"], p["gmat"],
      p["wqkv"], p["bqkv"], p["wout"], p["bout"])
    return out.reshape(N, H, W_, C)


# ============================================================================
# Parameter init (deterministic, kernel-ready layouts built once at init).
# ============================================================================

class KeyGen:
    def __init__(self, key):
        self.key = key

    def __call__(self):
        self.key, k = jax.random.split(self.key)
        return k


def _conv_weight(kg, cin, cout, kh, kw):
    fan_in = cin * kh * kw
    w = jax.random.normal(kg(), (kh, kw, cin, cout), jnp.float32) / math.sqrt(fan_in)
    return (w.reshape(kh * kw * cin, cout).astype(jnp.bfloat16),
            jnp.zeros((1, cout), jnp.float32))


def _linear(kg, din, dout):
    w = jax.random.normal(kg(), (din, dout), jnp.float32) / math.sqrt(din)
    return {"w": w, "b": jnp.zeros((dout,), jnp.float32)}


def _gn_params(c, groups=8):
    # TODO(synk): ResAttBlock GroupNorm group count not in the given source;
    # 8 groups assumed (matches the final nn.GroupNorm(8, ...)).
    cg = c // groups
    idx = jnp.arange(c) // cg
    gmat = (idx[:, None] == idx[None, :]).astype(jnp.float32) / cg
    return {"g": jnp.ones((1, c), jnp.float32),
            "b": jnp.zeros((1, c), jnp.float32),
            "gmat": gmat}


def _init_res_block(kg, cin, cout, t_dim, z_dim):
    w1, b1 = _conv_weight(kg, cin, cout, 3, 3)
    w2, b2 = _conv_weight(kg, cout, cout, 3, 3)
    p = {"norm1": _gn_params(cin), "norm2": _gn_params(cout),
         "conv1_w": w1, "conv1_b": b1, "conv2_w": w2, "conv2_b": b2,
         "time": _linear(kg, t_dim, cout), "z": _linear(kg, z_dim, cout)}
    if cin != cout:
        wsc = (jax.random.normal(kg(), (cin, cout), jnp.float32) /
               math.sqrt(cin)).astype(jnp.bfloat16)
    else:
        wsc = jnp.eye(cout, dtype=jnp.bfloat16)          # identity shortcut
    p["sc_w"] = wsc
    p["sc_b"] = jnp.zeros((1, cout), jnp.float32)
    return p


def _init_attn_block(kg, c, d_k):
    p = _gn_params(c)
    p["wqkv"] = (jax.random.normal(kg(), (c, 3 * c), jnp.float32) /
                 math.sqrt(c)).astype(jnp.bfloat16)      # packed [Wq | Wk | Wv]
    p["bqkv"] = jnp.zeros((1, 3 * c), jnp.float32)
    p["wout"] = (jax.random.normal(kg(), (c, c), jnp.float32) /
                 math.sqrt(c)).astype(jnp.bfloat16)
    p["bout"] = jnp.zeros((1, c), jnp.float32)
    p["n_heads"] = c // d_k
    p["d_k"] = d_k
    return p


def _init_downsample(kg, c):
    # Conv2d(c, c, 3, stride=2, padding=1) re-expressed as a 2x2 VALID conv on
    # the space-to-depth (4 parity phase) tensor -> no strided taps in-kernel,
    # no HBM im2col amplification.
    w = jax.random.normal(kg(), (c, c, 3, 3), jnp.float32) / math.sqrt(9 * c)
    W2 = jnp.zeros((2, 2, 4, c, c), jnp.float32)         # (di, dj, phase, ci, co)
    for di in range(2):
        for dj in range(2):
            for pr in range(2):
                for ps in range(2):
                    i_, j_ = 2 * di + pr, 2 * dj + ps
                    if i_ <= 2 and j_ <= 2:
                        W2 = W2.at[di, dj, pr * 2 + ps].set(w[:, :, i_, j_].T)
    return {"type": "down",
            "w": W2.reshape(2 * 2 * 4 * c, c).astype(jnp.bfloat16),
            "b": jnp.zeros((1, c), jnp.float32)}


def _init_upsample(kg, c):
    # ConvTranspose2d(c, c, 4, stride=2, padding=1): the 4 sub-pixel phases are
    # embedded into one 3x3 stride-1 conv with a lane-dense 4*c output; the
    # pixel shuffle is a single cheap XLA reshape afterwards.
    wt = jax.random.normal(kg(), (c, c, 4, 4), jnp.float32) / math.sqrt(16 * c)
    row_taps = {0: [(0, 3), (1, 1)], 1: [(1, 2), (2, 0)]}  # phase r -> [(tap i, ky)]
    W = jnp.zeros((3, 3, c, 4 * c), jnp.float32)
    for r in (0, 1):
        for s in (0, 1):
            ph = 2 * r + s
            for (i, ky) in row_taps[r]:
                for (j, kx) in row_taps[s]:
                    W = W.at[i, j, :, ph * c:(ph + 1) * c].set(wt[:, :, ky, kx])
    return {"type": "up",
            "w": W.reshape(9 * c, 4 * c).astype(jnp.bfloat16),
            "b": jnp.zeros((1, 4 * c), jnp.float32)}


def init_unet(kg, cfg):
    C0 = cfg["n_channels"]
    ch_mults, is_attn = cfg["ch_mults"], cfg["is_attn"]
    n_blocks, t_dim, z_dim = cfg["n_blocks"], cfg["t_dim"], cfg["z_dim"]
    d_k = cfg["attn_channels_per_head"]
    n_res = len(ch_mults)

    P = {}
    w, b = _conv_weight(kg, cfg["img_shape"][0], C0, 3, 3)
    P["image_proj"] = {"w": w, "b": b}
    P["time_emb"] = {"lin1": _linear(kg, t_dim // 4, t_dim),
                     "lin2": _linear(kg, t_dim, t_dim)}

    def res_att(cin, cout, has_attn):
        return {"type": "res",
                "res": _init_res_block(kg, cin, cout, t_dim, z_dim),
                "attn": _init_attn_block(kg, cout, d_k) if has_attn else None}

    down, h_channels = [], [C0]
    in_ch = out_ch = C0
    for i in range(n_res):
        out_ch = C0 * ch_mults[i]
        down.append(res_att(in_ch, out_ch, is_attn[i])); h_channels.append(out_ch)
        for _ in range(n_blocks - 1):
            down.append(res_att(out_ch, out_ch, is_attn[i])); h_channels.append(out_ch)
        if i < n_res - 1:
            down.append(_init_downsample(kg, out_ch)); h_channels.append(out_ch)
        in_ch = out_ch
    P["down"] = down

    P["middle"] = {"res1": _init_res_block(kg, out_ch, out_ch, t_dim, z_dim),
                   "attn": _init_attn_block(kg, out_ch, d_k),
                   "res2": _init_res_block(kg, out_ch, out_ch, t_dim, z_dim)}

    up, in_ch = [], out_ch
    for i in reversed(range(n_res)):
        out_ch = C0 * ch_mults[i]
        for _ in range(n_blocks + 1):
            up.append(res_att(in_ch + h_channels.pop(), out_ch, is_attn[i]))
            in_ch = out_ch
        if i > 0:
            up.append(_init_upsample(kg, out_ch))
    assert not h_channels
    P["up"] = up

    P["final_norm"] = _gn_params(out_ch)
    w, b = _conv_weight(kg, out_ch, cfg["img_shape"][0], 3, 3)
    P["final"] = {"w": w, "b": b}
    return P


# ============================================================================
# UNet forward (matches UNet.forward_core, c=None branch).  Tiny (M=batch)
# linears stay in plain JAX; everything spatial goes through the fused kernels.
# ============================================================================

def time_embedding(t, p, t_dim):
    half = t_dim // 8
    c = math.log(10000.0) / (half - 1)
    freqs = jnp.exp(jnp.arange(half, dtype=jnp.float32) * -c)
    e = t[:, None].astype(jnp.float32) * freqs[None, :]
    e = jnp.concatenate([jnp.sin(e), jnp.cos(e)], axis=1)
    e = silu(jnp.dot(e, p["lin1"]["w"]) + p["lin1"]["b"])
    return jnp.dot(e, p["lin2"]["w"]) + p["lin2"]["b"]


def _cond(t_emb, z_emb, p):
    return (jnp.dot(silu(t_emb), p["time"]["w"]) + p["time"]["b"] +
            jnp.dot(z_emb, p["z"]["w"]) + p["z"]["b"])


def res_block(x, cond, p):
    # h = conv1(SiLU(GN1(x))) + cond ; out = conv2(SiLU(GN2(h))) + shortcut(x)
    # dropout: identity at inference time.
    h = fused_conv(x, p["conv1_w"], p["conv1_b"], kh=3, kw=3, pad=1,
                   gn=p["norm1"], silu_act=True, cond=cond)
    return fused_conv(h, p["conv2_w"], p["conv2_b"], kh=3, kw=3, pad=1,
                      gn=p["norm2"], silu_act=True,
                      residual=(x, p["sc_w"], p["sc_b"]))


def res_att_block(x, t_emb, z_emb, blk):
    p = blk["res"]
    x = res_block(x, _cond(t_emb, z_emb, p), p)
    if blk["attn"] is not None:
        x = fused_attention(x, blk["attn"])
    return x


def downsample(x, p):
    N, H, W_, C = x.shape
    xp = jnp.pad(x, ((0, 0), (1, 1), (1, 1), (0, 0)))
    Hh, Wh = (H + 2) // 2, (W_ + 2) // 2
    xph = xp.reshape(N, Hh, 2, Wh, 2, C).transpose(0, 1, 3, 2, 4, 5)
    xph = xph.reshape(N, Hh, Wh, 4 * C)                   # space-to-depth, once
    return fused_conv(xph, p["w"], p["b"], kh=2, kw=2, pad=0)


def upsample(x, p):
    N, H, W_, _ = x.shape
    C = p["b"].shape[-1] // 4
    y = fused_conv(x, p["w"], p["b"], kh=3, kw=3, pad=1)  # (N, H, W, 4*C)
    y = y.reshape(N, H, W_, 2, 2, C).transpose(0, 1, 3, 2, 4, 5)
    return y.reshape(N, 2 * H, 2 * W_, C)                 # pixel shuffle


def unet_forward(params, x, t, z, drop_mask, cfg):
    t_emb = time_embedding(t, params["time_emb"], cfg["t_dim"])
    # TODO(synk): LatentEmbedding source not provided; classifier-free-guidance
    # style masking (zero z where drop_mask == 0) is assumed.
    z_emb = z.astype(jnp.float32) * drop_mask.astype(jnp.float32)[:, None]

    x = jnp.transpose(x, (0, 2, 3, 1)).astype(jnp.bfloat16)   # NCHW -> NHWC
    x = fused_conv(x, params["image_proj"]["w"], params["image_proj"]["b"],
                   kh=3, kw=3, pad=1)
    h = [x]
    for blk in params["down"]:
        if blk["type"] == "down":
            x = downsample(x, blk)
        else:
            x = res_att_block(x, t_emb, z_emb, blk)
        h.append(x)

    mid = params["middle"]
    x = res_block(x, _cond(t_emb, z_emb, mid["res1"]), mid["res1"])
    x = fused_attention(x, mid["attn"])
    x = res_block(x, _cond(t_emb, z_emb, mid["res2"]), mid["res2"])

    for blk in params["up"]:
        if blk["type"] == "up":
            x = upsample(x, blk)
        else:
            s = h.pop()
            x = jnp.concatenate([x, s], axis=-1)          # skip concat (NHWC)
            x = res_att_block(x, t_emb, z_emb, blk)

    x = fused_conv(x, params["final"]["w"], params["final"]["b"],
                   kh=3, kw=3, pad=1, gn=params["final_norm"], silu_act=True,
                   out_dtype=jnp.float32)
    return jnp.transpose(x, (0, 3, 1, 2))                 # back to NCHW


# ============================================================================
# Main
# ============================================================================

if __name__ == "__main__":
    CFG = dict(
        img_shape=(3, 16, 16),
        n_channels=32,
        ch_mults=(1, 2),
        is_attn=(False, True),
        attn_channels_per_head=4,
        n_blocks=2,
        t_dim=64,
        z_dim=16,
    )

    key = jax.random.PRNGKey(0)
    kx, kt, kz, kp = jax.random.split(key, 4)
    B = 2
    x = jax.random.normal(kx, (B,) + CFG["img_shape"], jnp.float32)
    t = jax.random.uniform(kt, (B,), jnp.float32) * 1000.0
    z = jax.random.normal(kz, (B, CFG["z_dim"]), jnp.float32)
    drop_mask = jnp.ones((B,), jnp.float32)

    params = init_unet(KeyGen(kp), CFG)
    out = unet_forward(params, x, t, z, drop_mask, CFG)
    out = jax.block_until_ready(out)

    assert out.shape == (B,) + CFG["img_shape"], out.shape
    assert bool(jnp.all(jnp.isfinite(out)))
    print("KERNEL_OK")
</pallas_src>

<mosaic_0001>
module attributes {stable_mosaic.version = 11 : i64} {
  func.func @kernel(%arg0: i32, %arg1: memref<1x18x18x3xbf16, #tpu.memory_space<vmem>>, %arg2: memref<27x32xbf16, #tpu.memory_space<vmem>>, %arg3: memref<1x32xf32, #tpu.memory_space<vmem>>, %arg4: memref<1x16x16x32xbf16, #tpu.memory_space<vmem>>) attributes {dimension_semantics = [#tpu.dimension_semantics<parallel>], iteration_bounds = array<i64: 2>, scalar_prefetch = 0 : i64, scratch_operands = 0 : i64, tpu.core_type = #tpu.core_type<tc>, window_params = [{transform_indices = @transform_0, window_bounds = array<i64: 1, 18, 18, 3>}, {pipeline_mode = #tpu.pipeline_mode<synchronous>, transform_indices = @transform_1, window_bounds = array<i64: 27, 32>}, {pipeline_mode = #tpu.pipeline_mode<synchronous>, transform_indices = @transform_2, window_bounds = array<i64: 1, 32>}, {transform_indices = @transform_3, window_bounds = array<i64: 1, 16, 16, 32>}]} {
    %c0 = arith.constant 0 : index
    %c0_0 = arith.constant 0 : index
    %c0_1 = arith.constant 0 : index
    %c0_2 = arith.constant 0 : index
    %0 = vector.load %arg1[%c0, %c0_0, %c0_1, %c0_2] : memref<1x18x18x3xbf16, #tpu.memory_space<vmem>>, vector<1x18x18x3xbf16>
    %1 = vector.shape_cast %0 : vector<1x18x18x3xbf16> to vector<18x18x3xbf16>
    %2 = arith.extf %1 : vector<18x18x3xbf16> to vector<18x18x3xf32>
    %3 = arith.truncf %2 : vector<18x18x3xf32> to vector<18x18x3xbf16>
    %4 = vector.extract_strided_slice %3 {offsets = [0, 0, 0], sizes = [16, 16, 3], strides = [1, 1, 1]} : vector<18x18x3xbf16> to vector<16x16x3xbf16>
    %5 = vector.shape_cast %4 : vector<16x16x3xbf16> to vector<256x3xbf16>
    %6 = vector.extract_strided_slice %3 {offsets = [0, 1, 0], sizes = [16, 16, 3], strides = [1, 1, 1]} : vector<18x18x3xbf16> to vector<16x16x3xbf16>
    %7 = vector.shape_cast %6 : vector<16x16x3xbf16> to vector<256x3xbf16>
    %8 = vector.extract_strided_slice %3 {offsets = [0, 2, 0], sizes = [16, 16, 3], strides = [1, 1, 1]} : vector<18x18x3xbf16> to vector<16x16x3xbf16>
    %9 = vector.shape_cast %8 : vector<16x16x3xbf16> to vector<256x3xbf16>
    %10 = vector.extract_strided_slice %3 {offsets = [1, 0, 0], sizes = [16, 16, 3], strides = [1, 1, 1]} : vector<18x18x3xbf16> to vector<16x16x3xbf16>
    %11 = vector.shape_cast %10 : vector<16x16x3xbf16> to vector<256x3xbf16>
    %12 = vector.extract_strided_slice %3 {offsets = [1, 1, 0], sizes = [16, 16, 3], strides = [1, 1, 1]} : vector<18x18x3xbf16> to vector<16x16x3xbf16>
    %13 = vector.shape_cast %12 : vector<16x16x3xbf16> to vector<256x3xbf16>
    %14 = vector.extract_strided_slice %3 {offsets = [1, 2, 0], sizes = [16, 16, 3], strides = [1, 1, 1]} : vector<18x18x3xbf16> to vector<16x16x3xbf16>
    %15 = vector.shape_cast %14 : vector<16x16x3xbf16> to vector<256x3xbf16>
    %16 = vector.extract_strided_slice %3 {offsets = [2, 0, 0], sizes = [16, 16, 3], strides = [1, 1, 1]} : vector<18x18x3xbf16> to vector<16x16x3xbf16>
    %17 = vector.shape_cast %16 : vector<16x16x3xbf16> to vector<256x3xbf16>
    %18 = vector.extract_strided_slice %3 {offsets = [2, 1, 0], sizes = [16, 16, 3], strides = [1, 1, 1]} : vector<18x18x3xbf16> to vector<16x16x3xbf16>
    %19 = vector.shape_cast %18 : vector<16x16x3xbf16> to vector<256x3xbf16>
    %20 = vector.extract_strided_slice %3 {offsets = [2, 2, 0], sizes = [16, 16, 3], strides = [1, 1, 1]} : vector<18x18x3xbf16> to vector<16x16x3xbf16>
    %21 = vector.shape_cast %20 : vector<16x16x3xbf16> to vector<256x3xbf16>
    %22 = tpu.concatenate %5, %7, %9, %11, %13, %15, %17, %19, %21 in 1 : vector<256x3xbf16>, vector<256x3xbf16>, vector<256x3xbf16>, vector<256x3xbf16>, vector<256x3xbf16>, vector<256x3xbf16>, vector<256x3xbf16>, vector<256x3xbf16>, vector<256x3xbf16> -> vector<256x27xbf16>
    %c0_3 = arith.constant 0 : index
    %c0_4 = arith.constant 0 : index
    %23 = vector.load %arg2[%c0_3, %c0_4] : memref<27x32xbf16, #tpu.memory_space<vmem>>, vector<27x32xbf16>
    %cst = arith.constant dense<0.000000e+00> : vector<256x32xf32>
    %24 = tpu.matmul %22, %23, %cst {dimension_numbers = #tpu.dot_dimension_numbers<[1], [0], [0], [1], [0, 0, 1, 1], [], []>} : vector<256x27xbf16>, vector<27x32xbf16>, vector<256x32xf32> -> vector<256x32xf32>
    %c0_5 = arith.constant 0 : index
    %c0_6 = arith.constant 0 : index
    %25 = vector.load %arg3[%c0_5, %c0_6] : memref<1x32xf32, #tpu.memory_space<vmem>>, vector<1x32xf32>
    %26 = vector.broadcast %25 : vector<1x32xf32> to vector<256x32xf32>
    %27 = arith.addf %24, %26 : vector<256x32xf32>
    %28 = vector.shape_cast %27 : vector<256x32xf32> to vector<16x16x32xf32>
    %29 = arith.truncf %28 : vector<16x16x32xf32> to vector<16x16x32xbf16>
    %c0_7 = arith.constant 0 : index
    %c0_8 = arith.constant 0 : index
    %c0_9 = arith.constant 0 : index
    %c0_10 = arith.constant 0 : index
    %30 = vector.load %arg4[%c0_7, %c0_8, %c0_9, %c0_10] : memref<1x16x16x32xbf16, #tpu.memory_space<vmem>>, vector<1x16x16x32xbf16>
    %31 = vector.shape_cast %30 : vector<1x16x16x32xbf16> to vector<16x16x32xbf16>
    %32 = vector.shape_cast %29 : vector<16x16x32xbf16> to vector<1x16x16x32xbf16>
    tpu.vector_store %arg4[%c0_7, %c0_8, %c0_9, %c0_10], %32 {strides = array<i32>} : memref<1x16x16x32xbf16, #tpu.memory_space<vmem>>, vector<1x16x16x32xbf16>,
    return
  }
  func.func @transform_0(%arg0: i32) -> (i32, i32, i32, i32) {
    %c0_i32 = arith.constant 0 : i32
    %c0_i32_0 = arith.constant 0 : i32
    %c0_i32_1 = arith.constant 0 : i32
    %c0_i32_2 = arith.constant 0 : i32
    return %arg0, %c0_i32, %c0_i32_0, %c0_i32_1 : i32, i32, i32, i32
  }
  func.func @transform_1(%arg0: i32) -> (i32, i32) {
    %c0_i32 = arith.constant 0 : i32
    %c0_i32_0 = arith.constant 0 : i32
    %c0_i32_1 = arith.constant 0 : i32
    return %c0_i32, %c0_i32_0 : i32, i32
  }
  func.func @transform_2(%arg0: i32) -> (i32, i32) {
    %c0_i32 = arith.constant 0 : i32
    %c0_i32_0 = arith.constant 0 : i32
    %c0_i32_1 = arith.constant 0 : i32
    return %c0_i32, %c0_i32_0 : i32, i32
  }
  func.func @transform_3(%arg0: i32) -> (i32, i32, i32, i32) {
    %c0_i32 = arith.constant 0 : i32
    %c0_i32_0 = arith.constant 0 : i32
    %c0_i32_1 = arith.constant 0 : i32
    %c0_i32_2 = arith.constant 0 : i32
    return %arg0, %c0_i32, %c0_i32_0, %c0_i32_1 : i32, i32, i32, i32
  }
}

</mosaic_0001>

<bundles_post_ra>
// kernel: tpu_custom_call.1
= control target key start
LH: loop header
LB: loop body
LE: loop exit
PB: predicated region body
PF: predicated region fallthrough
CT: control target
= control target key end

     0   :  { %8 = vsyncpa [#allocation3], 0  ;;  %s3692_s0 = inlined_call_operand.vmem [shape: bf16[2,18,18,3], index: 0, kind: input, shape index: {}]   ;;  %s3693_s1 = inlined_call_operand.vmem [shape: bf16[27,32], index: 1, kind: input, shape index: {}]   ;;  %s3694_s2 = inlined_call_operand.vmem [shape: f32[1,32], index: 2, kind: input, shape index: {}]   ;;  %s3695_s3 = inlined_call_operand.hbm [shape: bf16[2,16,16,32], index: 3, kind: output, shape index: {}]  }
   0x1   :  { %10 = vsyncpa [#allocation3 + $0x1], 0  ;;  %s2392_s12 = smov 0   ;;  %s2394_s13 = smov 0  }
   0x2   :  { %s2396_s14 = smov 0   ;;  %s2398_s15 = smov 0  }
   0x3 LB: > { %s2413_s16 = sadd.s32 4294967295, %s2358_s15   ;;  %s2000_s17 = sadd.s32 4294967294, %s2358_s15   ;;  %s2358_s15 = sphi %s2398_s15, %s3726_s15   ;;  %s2354_s14 = sphi %s2396_s14, %s3725_s14   ;;  %s2350_s13 = sphi %s2394_s13, %s3724_s13   ;;  %s2346_s12 = sphi %s2392_s12, %s3723_s12  }
   0x4   : > { %s2417_s18 = sadd.s32 1, %s2358_s15   ;;  %s91_s19 = sadd.s32 1, %s2354_s14 }
   0x5   : > { %s88_s20 = ssub.s32 %s2358_s15, %s2417_s18  ;;  %p101_p0 = scmp.ne.s32.totalorder %s2354_s14, %s2350_s13 }
   0x6   : > { %p89_p1 = scmp.eq.s32.totalorder %s88_s20, 0  ;;  %p102_p2 = scmp.eq.s32.totalorder %s2413_s16, 1 }
   0x7   : > { %p107_p3 = scmp.ne.s32.totalorder %s2350_s13, %s2346_s12  ;;  %p108_p4 = scmp.eq.s32.totalorder %s2000_s17, 1 }
   0x8   : > { %s2428_s21 = scalar_select %p89_p1, %s2354_s14, %s91_s19  }
   0x9   : > { %p2430_p5 = por %p102_p2, %p101_p0  ;;  %p2434_p6 = por %p108_p4, %p107_p3 }
   0xa   : > { %p2003_p7 = scmp.ge.s32.totalorder %s2358_s15, 1  ;;  %p140_p8 = scmp.lt.s32.totalorder %s2358_s15, 3 }
   0xc   : > { %p141_p9 = pnand %p2003_p7, %p140_p8 }
   0xe   : > { %144 = sbr.rel (%p141_p9) target bundleno = 648 (0x288), region = 32 }
  0x15   : > { %p164_p10 = scmp.lt.s32.totalorder %s2413_s16, 1  ;;  %vm659_vm0 = vcmask 1042432   ;;  %vm660_vm1 = vcmask 1046532   ;;  %vm224_vm2 = vsmask.f32 3328  ;;  %s2360_s29 = smov 9  }
  0x16   : > { %vm225_vm3 = vsmask.f32 7440  ;;  %vm2477_vm4 = vmor %vm659_vm0, %vm660_vm1  ;;  %s2361_s30 = smov 6   ;;  %s2362_s4 = smov 3   ;;  %vm1595_vm6 = vcmask 1044480   ;;  %vm1596_vm7 = vcmask 1045504  }
  0x17   : > { %s165_s24 = scalar_select %p164_p10, %s2413_s16, 1  ;;  %vm2522_vm5 = vmor %vm224_vm2, %vm225_vm3  ;;  %vm1260_vm8 = vcmask 23552   ;;  %vm1309_vm9 = vcmask 48128   ;;  %vm1342_vm10 = vcmask 72704   ;;  %vm1375_vm11 = vcmask 97280  }
  0x18   : > { %s2363_s5 = smov 12   ;;  %s2364_s6 = smov 15   ;;  %vm1408_vm12 = vcmask 121856   ;;  %vm1441_vm13 = vcmask 146432   ;;  %vm1474_vm14 = vcmask 171008   ;;  %vm1507_vm15 = vcmask 195584  }
  0x19   : > { %s2225_s25 = smul.u32 216, %s165_s24  ;;  %s2365_s7 = smov 18   ;;  %vm1562_vm0 = vcmask 220160   ;;  %vm1891_vm1 = vcmask 257024  }
  0x1a   : > { %s2366_s8 = smov 21   ;;  %s2367_s11 = smov 24  }
  0x1b   : > { %s2445_s28 = scalar_lea.vmem %s3692_s0, %s2225_s25  ;;  %s161_s20 = sand.u32 1, %s2350_s13  }
  0x1c   : > { %v2448_v0 = vld [vmem:[%s2445_s28 + $0x6c] sm:$0xf]  ;;  %v2451_v1 = vld [vmem:[%s2445_s28 + $0x70] sm:$0xf]  ;;  %v2465_v12 = vld [vmem:[%s2445_s28 + $0x60] sm:$0xf] }
  0x1d   : > { %v173_v2 = vld [vmem:[%s2445_s28 + $0xc] sm:$0xf]  ;;  %v457_v3 = vshrl.u32 %v2451_v1, 16  ;;  %v2457_v4 = vcombine.low %v2448_v0, %v2451_v1  ;;  %v444_v5 = vshrl.u32 %v2448_v0, 16  ;;  %v447_v6 = vshll.u32 %v2448_v0, 16  ;;  %s2004_s26 = sshll.u32 %s161_s20, 7 }
  0x1e   : > { %v174_v7 = vld [vmem:[%s2445_s28 + $0x10] sm:$0xf]  ;;  %v252_v11 = vshrl.u32 %v173_v2, 16  ;;  %v255_v13 = vshll.u32 %v173_v2, 16  ;;  %v2470_v14 = vld [vmem:[%s2445_s28 + $0x64] sm:$0xf] }
  0x1f   : > { %v261_v8 = vshll.u32 %v174_v7, 16  ;;  %v265_v9 = vshrl.u32 %v174_v7, 16  ;;  %v2462_v10 = vcombine.low %v173_v2, %v174_v7  ;;  %1069 = vrot.lane.b32.xlu1 %v2457_v4, %s2360_s29  ;;  %v2473_v15 = vld [vmem:[%s2445_s28 + $0x68] sm:$0x1]  ;;  %v2014_v17 = vrot.slane %v2465_v12, 9  ;;  %s3546_s27 = scalar_lea.vmem [#allocation2], %s2004_s26 }
  0x20   : > { %v254_v19 = vrot.slane %v252_v11, 4  ;;  %v720_v20 = vrot.slane %v2470_v14, 5  ;;  %v723_v21 = vrot.slane %v2473_v15, 5  ;;  %v2487_v22 = vld [vmem:[%s2445_s28] sm:$0xf]  ;;  %v257_v23 = vrot.slane %v255_v13, 5 }
  0x21   : > { %v267_v18 = vrot.slane %v265_v9, 4  ;;  %1053 = vrot.lane.b32.xlu0 %v2462_v10, %s2360_s29  ;;  %v2490_v24 = vld [vmem:[%s2445_s28 + $0x4] sm:$0xf]  ;;  %v172_v25 = vld [vmem:[%s2445_s28 + $0x8] sm:$0x1]  ;;  %v2006_v26 = vrot.slane %v2487_v22, 9 }
  0x22   : > { %v721_v27 = vsel %vm2477_vm4, %v2014_v17, %v720_v20  ;;  %v722_v28 = vrot.slane %v720_v20, 4  ;;  %v664_v29 = vrot.slane %v2490_v24, 5  ;;  %v667_v30 = vrot.slane %v172_v25, 5  ;;  %v2498_v31 = vld [vmem:[%s2445_s28 + $0x74] sm:$0x1] }
  0x23   : > { %v2015_v32 = vrot.slane %v2448_v0, 9  ;;  %v727_v33 = vrot.slane %v2451_v1, 5  ;;  %v730_v34 = vrot.slane %v2498_v31, 5  ;;  %v175_v35 = vld [vmem:[%s2445_s28 + $0x14] sm:$0x1]  ;;  %v2007_v36 = vrot.slane %v173_v2, 9 }
  0x24   : > { %v724_v37 = vsel %vm2477_vm4, %v722_v28, %v723_v21  ;;  %v665_v38 = vsel %vm2477_vm4, %v2006_v26, %v664_v29  ;;  %v666_v39 = vrot.slane %v664_v29, 4  ;;  %v671_v40 = vrot.slane %v174_v7, 5 }
  0x25   : > { %v2508_v41 = vcombine.low %v721_v27, %v724_v37  ;;  %v728_v42 = vsel %vm2477_vm4, %v2015_v32, %v727_v33  ;;  %v729_v43 = vrot.slane %v727_v33, 4  ;;  %v674_v44 = vrot.slane %v175_v35, 5 }
  0x26   : > { %v668_v45 = vsel %vm2477_vm4, %v666_v39, %v667_v30  ;;  %v672_v46 = vsel %vm2477_vm4, %v2007_v36, %v671_v40  ;;  %v673_v47 = vrot.slane %v671_v40, 4  ;;  %v258_v48 = vor.u32 %v257_v23, %v254_v19  ;;  %v2566_v39 = vld [vmem:[%s2445_s28 + $0x7c] sm:$0xf] }
  0x27   : > { %1034 = vrot.lane.b32.xlu1 %v2508_v41, %s2361_s30  ;;  %v2056_v49 = vcombine.low %v665_v38, %v668_v45  ;;  %v731_v50 = vsel %vm2477_vm4, %v729_v43, %v730_v34  ;;  %v263_v52 = vrot.slane %v261_v8, 5  ;;  %v271_v53 = vshll.u32 %v175_v35, 16  ;;  %v2561_v35 = vld [vmem:[%s2445_s28 + $0x78] sm:$0xf] }
  0x28   : > { %v2526_v54 = vcombine.low %v728_v42, %v731_v50  ;;  %v675_v55 = vsel %vm2477_vm4, %v673_v47, %v674_v44  ;;  %v259_v56 = vrot.slane %v258_v48, 4  ;;  %v228_v57 = vshrl.u32 %v2487_v22, 16  ;;  %v2578_v50 = vld [vmem:[%s2445_s28 + $0x1c] sm:$0xf] }
  0x29   : > { %1018 = vrot.lane.b32.xlu0 %v2056_v49, %s2361_s30  ;;  %v2532_v58 = vcombine.low %v672_v46, %v675_v55  ;;  %v268_v59 = vor.u32 %v267_v18, %v263_v52  ;;  %v273_v60 = vrot.slane %v271_v53, 5  ;;  %v231_v61 = vshll.u32 %v2487_v22, 16  ;;  %v2575_v49 = vld [vmem:[%s2445_s28 + $0x18] sm:$0xf] }
  0x2a   : > { %3709 = vst [vmem:[#allocation5_spill] sm:$0xff] %v2526_v54  ;;  %v264_v62 = vsel %vm2522_vm5, %v259_v56, %v263_v52  ;;  %v230_v63 = vrot.slane %v228_v57, 4  ;;  %v237_v2 = vshll.u32 %v2490_v24, 16  ;;  %v241_v7 = vshrl.u32 %v2490_v24, 16 }
  0x2b   : > { %1036 = vrot.lane.b32.xlu1 %v2526_v54, %s2361_s30  ;;  %v269_v8 = vrot.slane %v268_v59, 4  ;;  %v233_v9 = vrot.slane %v231_v61, 5  ;;  %v247_v11 = vshll.u32 %v172_v25, 16  ;;  %v446_v13 = vrot.slane %v444_v5, 4 }
  0x2c   : > { %v239_v17 = vrot.slane %v237_v2, 5  ;;  %v243_v18 = vrot.slane %v241_v7, 4  ;;  %v449_v19 = vrot.slane %v447_v6, 5  ;;  %v453_v20 = vshll.u32 %v2451_v1, 16 }
  0x2d   : > { %1020 = vrot.lane.b32.xlu0 %v2532_v58, %s2361_s30  ;;  %v274_v21 = vsel %vm2522_vm5, %v269_v8, %v273_v60  ;;  %v234_v23 = vor.u32 %v233_v9, %v230_v63  ;;  %v249_v26 = vrot.slane %v247_v11, 5  ;;  %v459_v25 = vrot.slane %v457_v3, 4  ;;  %v202_v60 = vld [vmem:[%s2445_s28 + $0x80] sm:$0x1] }
  0x2e   : > { %v2552_v5 = vcombine.low %v264_v62, %v274_v21  ;;  %v244_v27 = vor.u32 %v243_v18, %v239_v17  ;;  %v450_v28 = vor.u32 %v449_v19, %v446_v13  ;;  %v455_v0 = vrot.slane %v453_v20, 5  ;;  %v2602_v20 = vld [vmem:[%s2445_s28 + $0x20] sm:$0x1] }
  0x2f   : > { %v235_v6 = vrot.slane %v234_v23, 4  ;;  %v463_v29 = vshll.u32 %v2498_v31, 16  ;;  %v420_v30 = vshrl.u32 %v2465_v12, 16  ;;  %v423_v32 = vshll.u32 %v2465_v12, 16 }
  0x30   : > { %940 = vrot.lane.b32.xlu1 %v2552_v5, %s2362_s4  ;;  %v245_v1 = vrot.slane %v244_v27, 4  ;;  %v451_v33 = vrot.slane %v450_v28, 4  ;;  %v460_v3 = vor.u32 %v459_v25, %v455_v0  ;;  %v429_v34 = vshll.u32 %v2470_v14, 16 }
  0x31   : > { %v240_v31 = vsel %vm2522_vm5, %v235_v6, %v239_v17  ;;  %v465_v36 = vrot.slane %v463_v29, 5  ;;  %v422_v37 = vrot.slane %v420_v30, 4  ;;  %v425_v38 = vrot.slane %v423_v32, 5 }
  0x32   : > { %v250_v40 = vsel %vm2522_vm5, %v245_v1, %v249_v26  ;;  %v456_v42 = vsel %vm2522_vm5, %v451_v33, %v455_v0  ;;  %v461_v43 = vrot.slane %v460_v3, 4  ;;  %v431_v44 = vrot.slane %v429_v34, 5 }
  0x33   : > { %v2040_v45 = vcombine.low %v240_v31, %v250_v40  ;;  %v426_v46 = vor.u32 %v425_v38, %v422_v37  ;;  %v433_v47 = vshrl.u32 %v2470_v14, 16  ;;  %v439_v48 = vshll.u32 %v2473_v15, 16 }
  0x34   : > { %v466_v52 = vsel %vm2522_vm5, %v461_v43, %v465_v36  ;;  %v468_v53 = vshrl.u32 %v2561_v35, 16  ;;  %v471_v55 = vshll.u32 %v2561_v35, 16  ;;  %v481_v56 = vshrl.u32 %v2566_v39, 16 }
  0x35   : > { %938 = vrot.lane.b32.xlu0 %v2040_v45, %s2362_s4  ;;  %v2586_v57 = vcombine.low %v456_v42, %v466_v52  ;;  %v427_v59 = vrot.slane %v426_v46, 4  ;;  %v435_v15 = vrot.slane %v433_v47, 4  ;;  %v441_v61 = vrot.slane %v439_v48, 5  ;;  %v2629_v52 = vld [vmem:[%s2445_s28 + $0x84] sm:$0xf] }
  0x36   : > { %v276_v62 = vshrl.u32 %v2575_v49, 16  ;;  %v279_v63 = vshll.u32 %v2575_v49, 16  ;;  %v289_v2 = vshrl.u32 %v2578_v50, 16  ;;  %v2598_v9 = vcombine.low %v2561_v35, %v2566_v39 }
  0x37   : > { %3710 = vst [vmem:[#allocation6_spill] sm:$0xff] %v2586_v57  ;;  %956 = vrot.lane.b32.xlu1 %v2586_v57, %s2362_s4  ;;  %v432_v7 = vsel %vm2522_vm5, %v427_v59, %v431_v44  ;;  %v436_v8 = vor.u32 %v435_v15, %v431_v44  ;;  %v470_v11 = vrot.slane %v468_v53, 4  ;;  %v473_v13 = vrot.slane %v471_v55, 5  ;;  %v2632_v53 = vld [vmem:[%s2445_s28 + $0x88] sm:$0xf] }
  0x38   : > { %v477_v17 = vshll.u32 %v2566_v39, 16  ;;  %v483_v18 = vrot.slane %v481_v56, 4  ;;  %v487_v19 = vshll.u32 %v202_v60, 16  ;;  %v278_v23 = vrot.slane %v276_v62, 4 }
  0x39   : > { %v437_v21 = vrot.slane %v436_v8, 4  ;;  %v281_v26 = vrot.slane %v279_v63, 5  ;;  %v285_v25 = vshll.u32 %v2578_v50, 16  ;;  %v474_v27 = vor.u32 %v473_v13, %v470_v11  ;;  %v2662_v13 = vld [vmem:[%s2445_s28 + $0x24] sm:$0xf] }
  0x3a   : > { %v479_v28 = vrot.slane %v477_v17, 5  ;;  %v291_v0 = vrot.slane %v289_v2, 4  ;;  %v295_v32 = vshll.u32 %v2602_v20, 16  ;;  %v489_v34 = vrot.slane %v487_v19, 5  ;;  %v2665_v17 = vld [vmem:[%s2445_s28 + $0x28] sm:$0xf] }
  0x3b   : > { %v442_v6 = vsel %vm2522_vm5, %v437_v21, %v441_v61  ;;  %1071 = vrot.lane.b32.xlu1 %v2598_v9, %s2360_s29  ;;  %v282_v29 = vor.u32 %v281_v26, %v278_v23  ;;  %v287_v30 = vrot.slane %v285_v25, 5  ;;  %v475_v33 = vrot.slane %v474_v27, 4  ;;  %v205_v23 = vld [vmem:[%s2445_s28 + $0x8c] sm:$0x1] }
  0x3c   : > { %v2610_v1 = vcombine.low %v432_v7, %v442_v6  ;;  %v484_v3 = vor.u32 %v483_v18, %v479_v28  ;;  %v734_v36 = vrot.slane %v2566_v39, 5  ;;  %v2617_v37 = vcombine.low %v2575_v49, %v2578_v50 }
  0x3d   : > { %v292_v31 = vor.u32 %v291_v0, %v287_v30  ;;  %v480_v38 = vsel %vm2522_vm5, %v475_v33, %v479_v28  ;;  %v283_v42 = vrot.slane %v282_v29, 4  ;;  %v297_v44 = vrot.slane %v295_v32, 5 }
  0x3e   : > { %954 = vrot.lane.b32.xlu0 %v2610_v1, %s2362_s4  ;;  %v485_v40 = vrot.slane %v484_v3, 4  ;;  %v2016_v39 = vrot.slane %v2561_v35, 9  ;;  %v736_v46 = vrot.slane %v734_v36, 4  ;;  %v737_v47 = vrot.slane %v202_v60, 5 }
  0x3f   : > { %1104 = vrot.lane.b32.xlu1 %v2586_v57, %s2363_s5  ;;  %v293_v43 = vrot.slane %v292_v31, 4  ;;  %v288_v35 = vsel %vm2522_vm5, %v283_v42, %v287_v30  ;;  %v678_v59 = vrot.slane %v2578_v50, 5  ;;  %v492_v60 = vshrl.u32 %v2629_v52, 16  ;;  %v181_v42 = vld [vmem:[%s2445_s28 + $0x2c] sm:$0x1] }
  0x40   : > { %v490_v45 = vsel %vm2522_vm5, %v485_v40, %v489_v34  ;;  %v735_v56 = vsel %vm2477_vm4, %v2016_v39, %v734_v36  ;;  %v738_v15 = vsel %vm2477_vm4, %v736_v46, %v737_v47  ;;  %v495_v61 = vshll.u32 %v2629_v52, 16 }
  0x41   : > { %v2626_v48 = vcombine.low %v480_v38, %v490_v45  ;;  %v298_v55 = vsel %vm2522_vm5, %v293_v43, %v297_v44  ;;  %v505_v62 = vshrl.u32 %v2632_v53, 16  ;;  %v501_v63 = vshll.u32 %v2632_v53, 16 }
  0x42   : > { %1055 = vrot.lane.b32.xlu0 %v2617_v37, %s2360_s29  ;;  %v2653_v2 = vcombine.low %v288_v35, %v298_v55  ;;  %v2008_v7 = vrot.slane %v2575_v49, 9  ;;  %v2658_v50 = vcombine.low %v735_v56, %v738_v15  ;;  %v680_v8 = vrot.slane %v678_v59, 4  ;;  %v2290_v15 = vld [vmem:[%s3693_s1] sm:$0xff]  }
  0x43   : > { %1106 = vrot.lane.b32.xlu1 %v2626_v48, %s2363_s5  ;;  %v681_v11 = vrot.slane %v2602_v20, 5  ;;  %v494_v18 = vrot.slane %v492_v60, 4  ;;  %v497_v19 = vrot.slane %v495_v61, 5  ;;  %v507_v21 = vrot.slane %v505_v62, 4  ;;  %2185 = vmatprep.subr.bf16.mxu0 %v2290_v15 }
  0x44   : > { %v679_v49 = vsel %vm2477_vm4, %v2008_v7, %v678_v59  ;;  %v300_v26 = vshrl.u32 %v2662_v13, 16  ;;  %v303_v25 = vshll.u32 %v2662_v13, 16  ;;  %v313_v27 = vshrl.u32 %v2665_v17, 16  ;;  %2221 = vmatprep.subr.bf16.mxu1 %v2290_v15  ;;  %2186 = vmatpush3.bf16.msra.mxu0 %v2290_v15 }
  0x45   : > { %v682_v20 = vsel %vm2477_vm4, %v680_v8, %v681_v11  ;;  %v309_v28 = vshll.u32 %v2665_v17, 16  ;;  %v498_v0 = vor.u32 %v497_v19, %v494_v18  ;;  %v511_v29 = vshll.u32 %v205_v23, 16  ;;  %2223 = vmatpush3.bf16.msra.mxu1 %v2290_v15  ;;  %v2293_v15 = vld [vmem:[%s3693_s1 + $0x8] sm:$0x3f]  }
  0x46   : > { %1088 = vrot.lane.b32.xlu0 %v2552_v5, %s2363_s5  ;;  %v503_v5 = vrot.slane %v501_v63, 5  ;;  %v2682_v30 = vcombine.low %v679_v49, %v682_v20  ;;  %v2686_v32 = vcombine.low %v2629_v52, %v2632_v53  ;;  %v302_v33 = vrot.slane %v300_v26, 4  ;;  %v2752_v49 = vld [vmem:[%s2445_s28 + $0x94] sm:$0xf] }
  0x47   : > { %1139 = vrot.lane.b32.xlu1 %v2526_v54, %s2364_s6  ;;  %v305_v3 = vrot.slane %v303_v25, 5  ;;  %v311_v34 = vrot.slane %v309_v28, 5  ;;  %v315_v31 = vrot.slane %v313_v27, 4  ;;  %v499_v36 = vrot.slane %v498_v0, 4  ;;  %v2772_v28 = vld [vmem:[%s2445_s28 + $0x34] sm:$0xf] }
  0x48   : > { %v508_v6 = vor.u32 %v507_v21, %v503_v5  ;;  %v513_v40 = vrot.slane %v511_v29, 5  ;;  %v319_v44 = vshll.u32 %v181_v42, 16  ;;  %v2703_v46 = vcombine.low %v2662_v13, %v2665_v17 }
  0x49   : > { %v316_v43 = vor.u32 %v315_v31, %v311_v34  ;;  %v504_v39 = vsel %vm2522_vm5, %v499_v36, %v503_v5  ;;  %v741_v59 = vrot.slane %v2632_v53, 5  ;;  %v2017_v53 = vrot.slane %v2629_v52, 9 }
  0x4a   : > { %1090 = vrot.lane.b32.xlu0 %v2653_v2, %s2363_s5  ;;  %v509_v38 = vrot.slane %v508_v6, 4  ;;  %3711 = vst [vmem:[#allocation7_spill] sm:$0xff] %v2703_v46  ;;  %v321_v56 = vrot.slane %v319_v44, 5  ;;  %v744_v63 = vrot.slane %v205_v23, 5  ;;  %v685_v8 = vrot.slane %v2665_v17, 5 }
  0x4b   : > { %1141 = vrot.lane.b32.xlu1 %v2658_v50, %s2364_s6  ;;  %v317_v55 = vrot.slane %v316_v43, 4  ;;  %v743_v62 = vrot.slane %v741_v59, 4  ;;  %v742_v52 = vsel %vm2477_vm4, %v2017_v53, %v741_v59  ;;  %v2009_v19 = vrot.slane %v2662_v13, 9  ;;  %v2749_v23 = vld [vmem:[%s2445_s28 + $0x90] sm:$0xf] }
  0x4c   : > { %v514_v45 = vsel %vm2522_vm5, %v509_v38, %v513_v40  ;;  %v687_v5 = vrot.slane %v685_v8, 4  ;;  %v688_v21 = vrot.slane %v181_v42, 5  ;;  %v516_v26 = vshrl.u32 %v2749_v23, 16  ;;  %v184_v59 = vld [vmem:[%s2445_s28 + $0x38] sm:$0x1] }
  0x4d   : > { %v2707_v47 = vcombine.low %v504_v39, %v514_v45  ;;  %v322_v61 = vsel %vm2522_vm5, %v317_v55, %v321_v56  ;;  %v745_v11 = vsel %vm2477_vm4, %v743_v62, %v744_v63  ;;  %v686_v17 = vsel %vm2477_vm4, %v2009_v19, %v685_v8 }
  0x4e   : > { %1123 = vrot.lane.b32.xlu0 %v2532_v58, %s2364_s6  ;;  %v306_v58 = vor.u32 %v305_v3, %v302_v33  ;;  %v2737_v18 = vcombine.low %v742_v52, %v745_v11  ;;  %v519_v20 = vshll.u32 %v2749_v23, 16  ;;  %v529_v25 = vshrl.u32 %v2752_v49, 16  ;;  %v208_v3 = vld [vmem:[%s2445_s28 + $0x98] sm:$0x1] }
  0x4f   : > { %1174 = vrot.lane.b32.xlu1 %v2598_v9, %s2365_s7  ;;  %v525_v27 = vshll.u32 %v2752_v49, 16  ;;  %v518_v0 = vrot.slane %v516_v26, 4  ;;  %v333_v36 = vshll.u32 %v2772_v28, 16  ;;  %v535_v42 = vshll.u32 %v208_v3, 16 }
  0x50   : > { %v307_v35 = vrot.slane %v306_v58, 4  ;;  %v521_v6 = vrot.slane %v519_v20, 5  ;;  %v531_v33 = vrot.slane %v529_v25, 4  ;;  %v2787_v58 = vcombine.low %v2749_v23, %v2752_v49 }
  0x51   : > { %v527_v29 = vrot.slane %v525_v27, 5  ;;  %v335_v39 = vrot.slane %v333_v36, 5  ;;  %v537_v56 = vrot.slane %v535_v42, 5  ;;  %v2368_v53 = vmov 65535   ;;  %v2816_v27 = vld [vmem:[%s2445_s28 + $0x9c] sm:$0xf] }
  0x52   : > { %1125 = vrot.lane.b32.xlu0 %v2682_v30, %s2364_s6  ;;  %v312_v60 = vsel %vm2522_vm5, %v307_v35, %v311_v34  ;;  %v522_v38 = vor.u32 %v521_v6, %v518_v0  ;;  %3712 = vst [vmem:[#allocation8_spill] sm:$0xff] %v2787_v58  ;;  %v1597_v62 = vsel %vm1595_vm6, 4294967295, %v2368_v53  ;;  %v748_v52 = vrot.slane %v2752_v49, 5  ;;  %v2819_v0 = vld [vmem:[%s2445_s28 + $0xa0] sm:$0xf] }
  0x53   : > { %1176 = vrot.lane.b32.xlu1 %v2686_v32, %s2365_s7  ;;  %v2724_v7 = vcombine.low %v312_v60, %v322_v61  ;;  %v532_v40 = vor.u32 %v531_v33, %v527_v29  ;;  %v343_v61 = vshll.u32 %v184_v59, 16  ;;  %v1598_v11 = vsel %vm1596_vm7, %v1597_v62, 0 }
  0x54   : > { %v523_v35 = vrot.slane %v522_v38, 4  ;;  %v1600_v19 = vand.u32 %v2293_v15, %v1598_v11  ;;  %v750_v20 = vrot.slane %v748_v52, 4  ;;  %v751_v25 = vrot.slane %v208_v3, 5 }
  0x55   : > { %v533_v55 = vrot.slane %v532_v40, 4  ;;  %v345_v49 = vrot.slane %v343_v61, 5  ;;  %v540_v33 = vshrl.u32 %v2816_v27, 16  ;;  %v695_v40 = vrot.slane %v184_v59, 5 }
  0x56   : > { %1158 = vrot.lane.b32.xlu0 %v2617_v37, %s2365_s7  ;;  %v528_v63 = vsel %vm2522_vm5, %v523_v35, %v527_v29  ;;  %2187 = vmatprep.subr.bf16.mxu0 %v1600_v19  ;;  %v752_v3 = vsel %vm2477_vm4, %v750_v20, %v751_v25 }
  0x57   : > { %1209 = vrot.lane.b32.xlu1 %v2626_v48, %s2366_s8  ;;  %v538_v8 = vsel %vm2522_vm5, %v533_v55, %v537_v56  ;;  %2222 = vmatprep.subr.bf16.mxu1 %v1600_v19 }
  0x58   : > { %2188 = vmatpush3.bf16.msra.mxu0 %v1600_v19  ;;  %2224 = vmatpush3.bf16.msra.mxu1 %v1600_v19 }
  0x5a   : > { %1160 = vrot.lane.b32.xlu0 %v2703_v46, %s2365_s7 }
  0x5b   : > { %1211 = vrot.lane.b32.xlu1 %v2707_v47, %s2366_s8 }
  0x5e   : > { %1193 = vrot.lane.b32.xlu0 %v2653_v2, %s2366_s8 }
  0x5f   : > { %1244 = vrot.lane.b32.xlu1 %v2658_v50, %s2367_s11 }
  0x62   : > { %1195 = vrot.lane.b32.xlu0 %v2724_v7, %s2366_s8 }
  0x63   : > { %958 = vrot.lane.b32.xlu1 %v2626_v48, %s2362_s4  ;;  %v689_v48 = vsel %vm2477_vm4, %v687_v5, %v688_v21  ;;  %v2018_v21 = vrot.slane %v2749_v23, 9 }
  0x64   : > { %v2756_v13 = vcombine.low %v686_v17, %v689_v48  ;;  %v2813_v17 = vcombine.low %v528_v63, %v538_v8  ;;  %v2872_v63 = vcombine.low %v2816_v27, %v2819_v0 }
  0x65   : > { %v749_v29 = vsel %vm2477_vm4, %v2018_v21, %v748_v52 }
  0x66   : > { %1228 = vrot.lane.b32.xlu0 %v2682_v30, %s2367_s11  ;;  %v2845_v42 = vcombine.low %v749_v29, %v752_v3  ;;  %3714 = vst [vmem:[#allocation10_spill] sm:$0xff] %v2872_v63 }
  0x67   : > { %1246 = vrot.lane.b32.xlu1 %v2737_v18, %s2367_s11 }
  0x6a   : > { %942 = vrot.lane.b32.xlu0 %v2653_v2, %s2362_s4  ;;  %v2769_v2 = vld [vmem:[%s2445_s28 + $0x30] sm:$0xf] }
  0x6b   : > { %960 = vrot.lane.b32.xlu1 %v2707_v47, %s2362_s4  ;;  %v324_v34 = vshrl.u32 %v2769_v2, 16  ;;  %v327_v31 = vshll.u32 %v2769_v2, 16  ;;  %v2808_v5 = vcombine.low %v2769_v2, %v2772_v28  ;;  %v2010_v36 = vrot.slane %v2769_v2, 9 }
  0x6d   : > { %v326_v43 = vrot.slane %v324_v34, 4  ;;  %v329_v44 = vrot.slane %v327_v31, 5  ;;  %3713 = vst [vmem:[#allocation9_spill] sm:$0xff] %v2808_v5  ;;  %v553_v34 = vshrl.u32 %v2819_v0, 16  ;;  %v549_v31 = vshll.u32 %v2819_v0, 16 }
  0x6e   : > { %1230 = vrot.lane.b32.xlu0 %v2756_v13, %s2367_s11 }
  0x6f   : > { %1038 = vrot.lane.b32.xlu1 %v2658_v50, %s2361_s30  ;;  %v337_v50 = vshrl.u32 %v2772_v28, 16  ;;  %v551_v35 = vrot.slane %v549_v31, 5  ;;  %v555_v55 = vrot.slane %v553_v34, 4 }
  0x71   : > { %v339_v45 = vrot.slane %v337_v50, 4  ;;  %v556_v61 = vor.u32 %v555_v55, %v551_v35 }
  0x72   : > { %944 = vrot.lane.b32.xlu0 %v2724_v7, %s2362_s4 }
  0x73   : > { %1040 = vrot.lane.b32.xlu1 %v2737_v18, %s2361_s30  ;;  %v340_v60 = vor.u32 %v339_v45, %v335_v39 }
  0x75   : > { %v341_v26 = vrot.slane %v340_v60, 4 }
  0x76   : > { %1022 = vrot.lane.b32.xlu0 %v2682_v30, %s2361_s30  ;;  %v330_v30 = vor.u32 %v329_v44, %v326_v43  ;;  %v2848_v43 = vld [vmem:[%s2445_s28 + $0x3c] sm:$0xf]  ;;  %v2851_v44 = vld [vmem:[%s2445_s28 + $0x40] sm:$0xf] }
  0x77   : > { %1073 = vrot.lane.b32.xlu1 %v2686_v32, %s2360_s29  ;;  %v346_v6 = vsel %vm2522_vm5, %v341_v26, %v345_v49  ;;  %v348_v56 = vshrl.u32 %v2848_v43, 16  ;;  %v351_v59 = vshll.u32 %v2848_v43, 16  ;;  %v361_v15 = vshrl.u32 %v2851_v44, 16  ;;  %v187_v49 = vld [vmem:[%s2445_s28 + $0x44] sm:$0x1] }
  0x78   : > { %v331_v48 = vrot.slane %v330_v30, 4  ;;  %v357_v30 = vshll.u32 %v2851_v44, 16  ;;  %v2891_v29 = vcombine.low %v2848_v43, %v2851_v44 }
  0x79   : > { %v350_v8 = vrot.slane %v348_v56, 4  ;;  %v353_v52 = vrot.slane %v351_v59, 5  ;;  %v363_v19 = vrot.slane %v361_v15, 4  ;;  %v699_v56 = vrot.slane %v2851_v44, 5 }
  0x7a   : > { %1024 = vrot.lane.b32.xlu0 %v2756_v13, %s2361_s30  ;;  %v336_v23 = vsel %vm2522_vm5, %v331_v48, %v335_v39  ;;  %v542_v39 = vrot.slane %v540_v33, 4  ;;  %v359_v11 = vrot.slane %v357_v30, 5  ;;  %v557_v48 = vrot.slane %v556_v61, 4  ;;  %3715 = vst [vmem:[#allocation11_spill] sm:$0xff] %v2891_v29 }
  0x7b   : > { %1075 = vrot.lane.b32.xlu1 %v2787_v58, %s2360_s29  ;;  %v2840_v50 = vcombine.low %v336_v23, %v346_v6  ;;  %v354_v20 = vor.u32 %v353_v52, %v350_v8  ;;  %v2011_v44 = vrot.slane %v2848_v43, 9  ;;  %v701_v30 = vrot.slane %v699_v56, 4  ;;  %v2948_v43 = vld [vmem:[%s2445_s28 + $0xa8] sm:$0xf]  ;;  %v2951_v52 = vld [vmem:[%s2445_s28 + $0xac] sm:$0xf] }
  0x7c   : > { %v364_v25 = vor.u32 %v363_v19, %v359_v11 }
  0x7d   : > { %v355_v3 = vrot.slane %v354_v20, 4 }
  0x7e   : > { %1057 = vrot.lane.b32.xlu0 %v2703_v46, %s2360_s29 }
  0x7f   : > { %1108 = vrot.lane.b32.xlu1 %v2707_v47, %s2363_s5  ;;  %v692_v47 = vrot.slane %v2772_v28, 5  ;;  %v543_v28 = vshll.u32 %v2816_v27, 16 }
  0x81   : > { %v694_v38 = vrot.slane %v692_v47, 4  ;;  %v545_v45 = vrot.slane %v543_v28, 5  ;;  %v693_v2 = vsel %vm2477_vm4, %v2010_v36, %v692_v47  ;;  %v367_v47 = vshll.u32 %v187_v49, 16 }
  0x82   : > { %1059 = vrot.lane.b32.xlu0 %v2808_v5, %s2360_s29  ;;  %v365_v28 = vrot.slane %v364_v25, 4  ;;  %v755_v36 = vrot.slane %v2819_v0, 5 }
  0x83   : > { %1110 = vrot.lane.b32.xlu1 %v2813_v17, %s2363_s5  ;;  %v546_v60 = vor.u32 %v545_v45, %v542_v39  ;;  %v369_v34 = vrot.slane %v367_v47, 5  ;;  %v2019_v45 = vrot.slane %v2816_v27, 9  ;;  %v2977_v47 = vld [vmem:[%s2445_s28 + $0x4c] sm:$0xf] }
  0x85   : > { %v547_v21 = vrot.slane %v546_v60, 4  ;;  %v370_v39 = vsel %vm2522_vm5, %v365_v28, %v369_v34  ;;  %v756_v27 = vsel %vm2477_vm4, %v2019_v45, %v755_v36  ;;  %v702_v60 = vrot.slane %v187_v49, 5 }
  0x86   : > { %1092 = vrot.lane.b32.xlu0 %v2724_v7, %s2363_s5  ;;  %v211_v7 = vld [vmem:[%s2445_s28 + $0xa4] sm:$0x1]  ;;  %v573_v49 = vshll.u32 %v2951_v52, 16  ;;  %v381_v45 = vshll.u32 %v2977_v47, 16 }
  0x87   : > { %1143 = vrot.lane.b32.xlu1 %v2737_v18, %s2364_s6  ;;  %v696_v18 = vsel %vm2477_vm4, %v694_v38, %v695_v40  ;;  %v559_v53 = vshll.u32 %v211_v7, 16  ;;  %v552_v23 = vsel %vm2522_vm5, %v547_v21, %v551_v35  ;;  %v360_v40 = vsel %vm2522_vm5, %v355_v3, %v359_v11 }
  0x88   : > { %v2868_v62 = vcombine.low %v693_v2, %v696_v18  ;;  %v757_v35 = vrot.slane %v755_v36, 4  ;;  %v758_v55 = vrot.slane %v211_v7, 5  ;;  %v2915_v0 = vcombine.low %v360_v40, %v370_v39  ;;  %v214_v36 = vld [vmem:[%s2445_s28 + $0xb0] sm:$0x1] }
  0x89   : > { %v561_v26 = vrot.slane %v559_v53, 5  ;;  %v700_v53 = vsel %vm2477_vm4, %v2011_v44, %v699_v56  ;;  %v564_v21 = vshrl.u32 %v2948_v43, 16  ;;  %v575_v3 = vrot.slane %v573_v49, 5 }
  0x8a   : > { %1094 = vrot.lane.b32.xlu0 %v2840_v50, %s2363_s5  ;;  %v759_v7 = vsel %vm2477_vm4, %v757_v35, %v758_v55  ;;  %v385_v39 = vshrl.u32 %v2977_v47, 16  ;;  %v2998_v44 = vcombine.low %v2948_v43, %v2951_v52 }
  0x8b   : > { %1145 = vrot.lane.b32.xlu1 %v2845_v42, %s2364_s6  ;;  %v562_v6 = vsel %vm2522_vm5, %v557_v48, %v561_v26  ;;  %v2932_v15 = vcombine.low %v756_v27, %v759_v7  ;;  %v567_v48 = vshll.u32 %v2948_v43, 16  ;;  %v577_v26 = vshrl.u32 %v2951_v52, 16 }
  0x8c   : > { %v2895_v33 = vcombine.low %v552_v23, %v562_v6  ;;  %v566_v23 = vrot.slane %v564_v21, 4  ;;  %v583_v27 = vshll.u32 %v214_v36, 16 }
  0x8d   : > { %v569_v6 = vrot.slane %v567_v48, 5  ;;  %v579_v28 = vrot.slane %v577_v26, 4 }
  0x8e   : > { %1127 = vrot.lane.b32.xlu0 %v2756_v13, %s2364_s6  ;;  %v585_v49 = vrot.slane %v583_v27, 5 }
  0x8f   : > { %1178 = vrot.lane.b32.xlu1 %v2787_v58, %s2365_s7  ;;  %v570_v55 = vor.u32 %v569_v6, %v566_v23  ;;  %v580_v56 = vor.u32 %v579_v28, %v575_v3  ;;  %v3005_v23 = vld [vmem:[%s2445_s28 + $0x50] sm:$0x1] }
  0x91   : > { %v2881_v13 = vpop.permute.xlu1 %1069  ;;  %v571_v48 = vrot.slane %v570_v55, 4  ;;  %v581_v26 = vrot.slane %v580_v56, 4  ;;  %v762_v55 = vrot.slane %v2951_v52, 5 }
  0x92   : > { %1129 = vrot.lane.b32.xlu0 %v2868_v62, %s2364_s6 }
  0x93   : > { %1180 = vrot.lane.b32.xlu1 %v2872_v63, %s2365_s7  ;;  %v2897_v31 = vpop.permute.xlu0 %1053 }
  0x96   : > { %1162 = vrot.lane.b32.xlu0 %v2808_v5, %s2365_s7  ;;  %v3042_v5 = vld [vmem:[%s2445_s28 + $0xb8] sm:$0xf] }
  0x97   : > { %1213 = vrot.lane.b32.xlu1 %v2813_v17, %s2366_s8 }
  0x99   : > { %v2900_v38 = vpop.permute.xlu1 %1034 }
  0x9a   : > { %1164 = vrot.lane.b32.xlu0 %v2891_v29, %s2365_s7 }
  0x9b   : > { %1215 = vrot.lane.b32.xlu1 %v2895_v33, %s2366_s8  ;;  %v2917_v18 = vpop.permute.xlu0 %1018 }
  0x9d   : > { %v2911_v2 = vpop.permute.xlu1 %1036 }
  0x9e   : > { %1197 = vrot.lane.b32.xlu0 %v2840_v50, %s2366_s8 }
  0x9f   : > { %1248 = vrot.lane.b32.xlu1 %v2845_v42, %s2367_s11  ;;  %v2935_v61 = vpop.permute.xlu0 %1020 }
  0xa2   : > { %1199 = vrot.lane.b32.xlu0 %v2915_v0, %s2366_s8  ;;  %v2930_v59 = vpop.permute.xlu1 %940 }
  0xa3   : > { %962 = vrot.lane.b32.xlu1 %v2813_v17, %s2362_s4  ;;  %v703_v17 = vsel %vm2477_vm4, %v701_v30, %v702_v60 }
  0xa4   : > { %v2957_v19 = vcombine.low %v700_v53, %v703_v17  ;;  %v383_v53 = vrot.slane %v381_v45, 5  ;;  %v387_v17 = vrot.slane %v385_v39, 4  ;;  %v576_v39 = vsel %vm2522_vm5, %v571_v48, %v575_v3 }
  0xa5   : > { %v586_v45 = vsel %vm2522_vm5, %v581_v26, %v585_v49  ;;  %v764_v26 = vrot.slane %v762_v55, 4  ;;  %v765_v49 = vrot.slane %v214_v36, 5 }
  0xa6   : > { %1232 = vrot.lane.b32.xlu0 %v2868_v62, %s2367_s11  ;;  %v388_v28 = vor.u32 %v387_v17, %v383_v53  ;;  %v3032_v3 = vcombine.low %v576_v39, %v586_v45  ;;  %v601_v39 = vshrl.u32 %v3042_v5, 16 }
  0xa7   : > { %1250 = vrot.lane.b32.xlu1 %v2932_v15, %s2367_s11  ;;  %v2955_v11 = vpop.permute.xlu0 %938 }
  0xa8   : > { %v389_v17 = vrot.slane %v388_v28, 4 }
  0xa9   : > { %v2945_v8 = vpop.permute.xlu1 %956 }
  0xaa   : > { %946 = vrot.lane.b32.xlu0 %v2840_v50, %s2362_s4  ;;  %v2972_v50 = vld [vmem:[%s2445_s28 + $0x48] sm:$0xf] }
  0xab   : > { %964 = vrot.lane.b32.xlu1 %v2895_v33, %s2362_s4  ;;  %v375_v40 = vshll.u32 %v2972_v50, 16  ;;  %v3027_v27 = vcombine.low %v2972_v50, %v2977_v47 }
  0xad   : > { %v2965_v20 = vpop.permute.xlu1 %1071  ;;  %v377_v60 = vrot.slane %v375_v40, 5 }
  0xae   : > { %1234 = vrot.lane.b32.xlu0 %v2957_v19, %s2367_s11 }
  0xaf   : > { %1042 = vrot.lane.b32.xlu1 %v2845_v42, %s2361_s30  ;;  %v372_v42 = vshrl.u32 %v2972_v50, 16 }
  0xb0   : > { %v2974_v25 = vpop.permute.xlu0 %954 }
  0xb1   : > { %v2979_v34 = vpop.permute.xlu1 %1104  ;;  %v374_v30 = vrot.slane %v372_v42, 4  ;;  %v391_v42 = vshll.u32 %v3005_v23, 16 }
  0xb2   : > { %948 = vrot.lane.b32.xlu0 %v2915_v0, %s2362_s4 }
  0xb3   : > { %1044 = vrot.lane.b32.xlu1 %v2932_v15, %s2361_s30  ;;  %v393_v48 = vrot.slane %v391_v42, 5 }
  0xb4   : > { %v2990_v35 = vpop.permute.xlu0 %1055 }
  0xb5   : > { %v2992_v7 = vpop.permute.xlu1 %1106 }
  0xb6   : > { %1026 = vrot.lane.b32.xlu0 %v2868_v62, %s2361_s30  ;;  %v378_v62 = vor.u32 %v377_v60, %v374_v30  ;;  %v2020_v30 = vrot.slane %v2948_v43, 9  ;;  %v3046_v43 = vcombine.low %v2465_v12, %v2470_v14 }
  0xb7   : > { %1077 = vrot.lane.b32.xlu1 %v2872_v63, %s2360_s29  ;;  %v3037_v63 = vld [vmem:[%s2445_s28 + $0xb4] sm:$0xf] }
  0xb8   : > { %v3002_v21 = vpop.permute.xlu0 %1088  ;;  %v379_v60 = vrot.slane %v378_v62, 4  ;;  %v394_v62 = vsel %vm2522_vm5, %v389_v17, %v393_v48  ;;  %v763_v28 = vsel %vm2477_vm4, %v2020_v30, %v762_v55  ;;  %v588_v12 = vshrl.u32 %v3037_v63, 16 }
  0xb9   : > { %v3007_v6 = vpop.permute.xlu1 %1139  ;;  %v591_v42 = vshll.u32 %v3037_v63, 16  ;;  %v709_v17 = vrot.slane %v3005_v23, 5  ;;  %v2024_v48 = vcombine.low %v2487_v22, %v2490_v24  ;;  %v603_v22 = vrot.slane %v601_v39, 4 }
  0xba   : > { %1028 = vrot.lane.b32.xlu0 %v2957_v19, %s2361_s30  ;;  %v384_v36 = vsel %vm2522_vm5, %v379_v60, %v383_v53  ;;  %v597_v53 = vshll.u32 %v3042_v5, 16  ;;  %v2012_v60 = vrot.slane %v2972_v50, 9  ;;  %v590_v23 = vrot.slane %v588_v12, 4 }
  0xbb   : > { %1079 = vrot.lane.b32.xlu1 %v2998_v44, %s2360_s29  ;;  %v3072_v55 = vcombine.low %v384_v36, %v394_v62  ;;  %v3090_v36 = vld [vmem:[%s2445_s28 + $0x58] sm:$0xf]  ;;  %v593_v62 = vrot.slane %v591_v42, 5  ;;  %v3121_v57 = vcombine.low %v3037_v63, %v3042_v5  ;;  %v1263_v46 = vsel %vm1260_vm8, %v2024_v48, %v2955_v11 }
  0xbc   : > { %v3014_v40 = vpop.permute.xlu0 %1090  ;;  %v3092_v58 = vrot.slane %v597_v53, 5  ;;  %v405_v39 = vshll.u32 %v3090_v36, 16 }
  0xbd   : > { %v3021_v56 = vpop.permute.xlu1 %1141  ;;  %v594_v53 = vor.u32 %v593_v62, %v590_v23 }
  0xbe   : > { %1061 = vrot.lane.b32.xlu0 %v2891_v29, %s2360_s29 }
  0xbf   : > { %1112 = vrot.lane.b32.xlu1 %v2895_v33, %s2363_s5  ;;  %v706_v33 = vrot.slane %v2977_v47, 5  ;;  %v766_v47 = vsel %vm2477_vm4, %v764_v26, %v765_v49  ;;  %v1287_v26 = vsel %vm1260_vm8, %v3046_v43, %v2974_v25  ;;  %v3085_v49 = vld [vmem:[%s2445_s28 + $0x54] sm:$0xf]  ;;  %v3097_v25 = vld [vmem:[%s2445_s28 + $0xbc] sm:$0x1] }
  0xc0   : > { %v3034_v52 = vpop.permute.xlu0 %1123  ;;  %v3082_v50 = vcombine.low %v763_v28, %v766_v47  ;;  %v1327_v28 = vsel %vm1309_vm9, %v1287_v26, %v2900_v38  ;;  %v396_v47 = vshrl.u32 %v3085_v49, 16  ;;  %v399_v42 = vshll.u32 %v3085_v49, 16 }
  0xc1   : > { %v3039_v29 = vpop.permute.xlu1 %1174  ;;  %v708_v30 = vrot.slane %v706_v33, 4 }
  0xc2   : > { %1063 = vrot.lane.b32.xlu0 %v3027_v27, %s2360_s29  ;;  %v398_v62 = vrot.slane %v396_v47, 4 }
  0xc3   : > { %1114 = vrot.lane.b32.xlu1 %v3032_v3, %s2363_s5  ;;  %v710_v12 = vsel %vm2477_vm4, %v708_v30, %v709_v17  ;;  %v607_v30 = vshll.u32 %v3097_v25, 16  ;;  %v1360_v17 = vsel %vm1342_vm10, %v1327_v28, %v2881_v13  ;;  %v3136_v28 = vrot.slane %v405_v39, 5 }
  0xc4   : > { %v3060_v14 = vpop.permute.xlu0 %1125  ;;  %v1393_v23 = vsel %vm1375_vm11, %v1360_v17, %v2979_v34 }
  0xc5   : > { %v3067_v45 = vpop.permute.xlu1 %1176  ;;  %v1426_v13 = vsel %vm1408_vm12, %v1393_v23, %v3007_v6  ;;  %v609_v47 = vrot.slane %v607_v30, 5  ;;  %v1290_v6 = vsel %vm1260_vm8, %v2457_v4, %v2945_v8 }
  0xc6   : > { %1096 = vrot.lane.b32.xlu0 %v2915_v0, %s2363_s5  ;;  %v1459_v34 = vsel %vm1441_vm13, %v1426_v13, %v3039_v29 }
  0xc7   : > { %1147 = vrot.lane.b32.xlu1 %v2932_v15, %s2364_s6  ;;  %v707_v15 = vsel %vm2477_vm4, %v2012_v60, %v706_v33  ;;  %v409_v33 = vshrl.u32 %v3090_v36, 16  ;;  %v604_v60 = vor.u32 %v603_v22, %v3092_v58  ;;  %v401_v22 = vrot.slane %v399_v42, 5 }
  0xc8   : > { %v3087_v0 = vpop.permute.xlu0 %1158  ;;  %v3117_v26 = vcombine.low %v707_v15, %v710_v12  ;;  %v3134_v15 = vld [vmem:[%s2445_s28 + $0x5c] sm:$0x1]  ;;  %v595_v12 = vrot.slane %v594_v53, 4  ;;  %v1311_v42 = vsel %vm1309_vm9, %v1263_v46, %v2917_v18  ;;  %v1329_v18 = vsel %vm1309_vm9, %v1290_v6, %v2911_v2 }
  0xc9   : > { %v1210_v24 = vpop.permute.xlu1 %1209  ;;  %v411_v11 = vrot.slane %v409_v33, 4  ;;  %v402_v29 = vor.u32 %v401_v22, %v398_v62  ;;  %v415_v39 = vshll.u32 %v3134_v15, 16  ;;  %v1344_v8 = vsel %vm1342_vm10, %v1311_v42, %v2897_v31 }
  0xca   : > { %1098 = vrot.lane.b32.xlu0 %v3072_v55, %s2363_s5  ;;  %v1492_v17 = vsel %vm1474_vm14, %v1459_v34, %v1210_v24  ;;  %v600_v53 = vsel %vm2522_vm5, %v595_v12, %v3092_v58  ;;  %v1362_v30 = vsel %vm1342_vm10, %v1329_v18, %v2965_v20  ;;  %v1377_v62 = vsel %vm1375_vm11, %v1344_v8, %v3002_v21 }
  0xcb   : > { %1149 = vrot.lane.b32.xlu1 %v3082_v50, %s2364_s6  ;;  %v412_v46 = vor.u32 %v411_v11, %v3136_v28  ;;  %v3169_v2 = vcombine.low %v3085_v49, %v3090_v36  ;;  %v1395_v31 = vsel %vm1375_vm11, %v1362_v30, %v2992_v7  ;;  %v1410_v58 = vsel %vm1408_vm12, %v1377_v62, %v3034_v52 }
  0xcc   : > { %v3111_v38 = vpop.permute.xlu0 %1160  ;;  %v403_v13 = vrot.slane %v402_v29, 4  ;;  %v417_v20 = vrot.slane %v415_v39, 5  ;;  %v1428_v21 = vsel %vm1408_vm12, %v1395_v31, %v3021_v56  ;;  %v1443_v11 = vsel %vm1441_vm13, %v1410_v58, %v3087_v0  ;;  %v219_v58 = vld [vmem:[%s2445_s28 + $0xc4] sm:$0xf] }
  0xcd   : > { %v1212_v54 = vpop.permute.xlu1 %1211  ;;  %v413_v7 = vrot.slane %v412_v46, 4  ;;  %v1266_v52 = vsel %vm1260_vm8, %v2462_v10, %v2930_v59  ;;  %v1461_v12 = vsel %vm1441_vm13, %v1428_v21, %v3067_v45  ;;  %v769_v56 = vrot.slane %v3042_v5, 5 }
  0xce   : > { %1131 = vrot.lane.b32.xlu0 %v2957_v19, %s2364_s6  ;;  %v605_v19 = vrot.slane %v604_v60, 4  ;;  %v1494_v0 = vsel %vm1474_vm14, %v1461_v12, %v1212_v54  ;;  %v1313_v59 = vsel %vm1309_vm9, %v1266_v52, %v2935_v61  ;;  %v408_v54 = vsel %vm2522_vm5, %v403_v13, %v3136_v28 }
  0xcf   : > { %1182 = vrot.lane.b32.xlu1 %v2998_v44, %s2365_s7  ;;  %v418_v5 = vsel %vm2522_vm5, %v413_v7, %v417_v20  ;;  %v1346_v45 = vsel %vm1342_vm10, %v1313_v59, %v2990_v35  ;;  %v771_v61 = vrot.slane %v769_v56, 4  ;;  %v788_v7 = vshrl.u32 %v219_v58, 16 }
  0xd0   : > { %v1194_v48 = vpop.permute.xlu0 %1193  ;;  %v610_v60 = vsel %vm2522_vm5, %v605_v19, %v609_v47  ;;  %v3224_v39 = vcombine.low %v408_v54, %v418_v5  ;;  %v784_v52 = vshll.u32 %v219_v58, 16 }
  0xd1   : > { %v1245_v23 = vpop.permute.xlu1 %1244  ;;  %v3185_v34 = vcombine.low %v600_v53, %v610_v60  ;;  %v1476_v19 = vsel %vm1474_vm14, %v1443_v11, %v1194_v48  ;;  %v716_v53 = vrot.slane %v3134_v15, 5  ;;  %v218_v15 = vld [vmem:[%s2445_s28 + $0xc0] sm:$0xf] }
  0xd2   : > { %1133 = vrot.lane.b32.xlu0 %v3117_v26, %s2364_s6  ;;  %v1525_v33 = vsel %vm1507_vm15, %v1492_v17, %v1245_v23  ;;  %v2021_v17 = vrot.slane %v3037_v63, 9  ;;  %v772_v23 = vrot.slane %v3097_v25, 5  ;;  %v713_v63 = vrot.slane %v3090_v36, 5 }
  0xd3   : > { %1184 = vrot.lane.b32.xlu1 %v3121_v57, %s2365_s7  ;;  %2205 = vmatprep.mubr.msk.bf16.mxu1 %vm1562_vm0, %v1525_v33  ;;  %v1379_v33 = vsel %vm1375_vm11, %v1346_v45, %v3014_v40  ;;  %v775_v21 = vshrl.u32 %v218_v15, 16  ;;  %v778_v11 = vshll.u32 %v218_v15, 16  ;;  %v2072_v45 = vcombine.low %v218_v15, %v219_v58 }
  0xd4   : > { %v1196_v24 = vpop.permute.xlu0 %1195  ;;  %v1412_v28 = vsel %vm1408_vm12, %v1379_v33, %v3060_v14  ;;  %v770_v46 = vsel %vm2477_vm4, %v2021_v17, %v769_v56  ;;  %v773_v14 = vsel %vm2477_vm4, %v771_v61, %v772_v23  ;;  %v786_v56 = vrot.slane %v784_v52, 5 }
  0xd5   : > { %v3171_v22 = vpop.permute.xlu1 %958  ;;  %v1445_v35 = vsel %vm1441_vm13, %v1412_v28, %v3111_v38  ;;  %v3244_v36 = vcombine.low %v770_v46, %v773_v14  ;;  %v2013_v38 = vrot.slane %v3085_v49, 9 }
  0xd6   : > { %1166 = vrot.lane.b32.xlu0 %v3027_v27, %s2365_s7  ;;  %v1478_v40 = vsel %vm1474_vm14, %v1445_v35, %v1196_v24  ;;  %v715_v24 = vrot.slane %v713_v63, 4 }
  0xd7   : > { %1217 = vrot.lane.b32.xlu1 %v3032_v3, %s2366_s8 }
  0xd8   : > { %v1229_v47 = vpop.permute.xlu0 %1228  ;;  %v717_v62 = vsel %vm2477_vm4, %v715_v24, %v716_v53  ;;  %v3319_v53 = vld [vmem:[%s2445_s28 + $0xcc] sm:$0xf] }
  0xd9   : > { %v1509_v42 = vsel %vm1507_vm15, %v1476_v19, %v1229_v47  ;;  %v1247_v6 = vpop.permute.xlu1 %1246  ;;  %v777_v19 = vrot.slane %v775_v21, 4  ;;  %v780_v47 = vrot.slane %v778_v11, 5 }
  0xda   : > { %1168 = vrot.lane.b32.xlu0 %v3169_v2, %s2365_s7  ;;  %2189 = vmatprep.mubr.msk.bf16.mxu0 %vm1562_vm0, %v1509_v42  ;;  %v1527_v10 = vsel %vm1507_vm15, %v1494_v0, %v1247_v6  ;;  %v790_v0 = vrot.slane %v788_v7, 4  ;;  %v220_v6 = vld [vmem:[%s2445_s28 + $0xc8] sm:$0x1] }
  0xdb   : > { %1219 = vrot.lane.b32.xlu1 %v3185_v34, %s2366_s8  ;;  %2206 = vmatmul.mubr.msk.bf16.vlgmr.msra.gmra.mrb[0].mxu1 %vm1562_vm0, %v1527_v10  ;;  %v781_v59 = vor.u32 %v780_v47, %v777_v19  ;;  %v806_v24 = vrot.slane %v220_v6, 5 }
  0xdc   : > { %v3212_v48 = vpop.permute.xlu0 %942  ;;  %v791_v54 = vor.u32 %v790_v0, %v786_v56 }
  0xdd   : > { %v3218_v29 = vpop.permute.xlu1 %960  ;;  %v782_v61 = vrot.slane %v781_v59, 4 }
  0xde   : > { %1201 = vrot.lane.b32.xlu0 %v3072_v55, %s2366_s8  ;;  %v792_v23 = vrot.slane %v791_v54, 4 }
  0xdf   : > { %1252 = vrot.lane.b32.xlu1 %v3082_v50, %s2367_s11 }
  0xe0   : > { %v1231_v25 = vpop.permute.xlu0 %1230 }
  0xe1   : > { %v1511_v18 = vsel %vm1507_vm15, %v1478_v40, %v1231_v25  ;;  %v3237_v8 = vpop.permute.xlu1 %1038  ;;  %v803_v40 = vrot.slane %v219_v58, 5  ;;  %v812_v58 = vshll.u32 %v3319_v53, 16 }
  0xe2   : > { %1203 = vrot.lane.b32.xlu0 %v3224_v39, %s2366_s8  ;;  %2190 = vmatmul.mubr.msk.bf16.vlgmr.msra.gmra.mrb[0].mxu0 %vm1562_vm0, %v1511_v18  ;;  %v2022_v18 = vrot.slane %v218_v15, 9 }
  0xe3   : > { %966 = vrot.lane.b32.xlu1 %v3032_v3, %s2362_s4  ;;  %v714_v3 = vsel %vm2477_vm4, %v2013_v38, %v713_v63  ;;  %v805_v38 = vrot.slane %v803_v40, 4  ;;  %v814_v0 = vrot.slane %v812_v58, 5 }
  0xe4   : > { %v3248_v60 = vpop.permute.xlu0 %944  ;;  %v3268_v13 = vcombine.low %v714_v3, %v717_v62  ;;  %v3322_v62 = vld [vmem:[%s2445_s28 + $0xd0] sm:$0xf]  ;;  %v804_v15 = vsel %vm2477_vm4, %v2022_v18, %v803_v40 }
  0xe5   : > { %v3250_v30 = vpop.permute.xlu1 %1040  ;;  %v807_v11 = vsel %vm2477_vm4, %v805_v38, %v806_v24  ;;  %v822_v7 = vshrl.u32 %v3322_v62, 16  ;;  %v818_v52 = vshll.u32 %v3322_v62, 16 }
  0xe6   : > { %1236 = vrot.lane.b32.xlu0 %v3117_v26, %s2367_s11  ;;  %v3342_v47 = vcombine.low %v804_v15, %v807_v11 }
  0xe7   : > { %1254 = vrot.lane.b32.xlu1 %v3244_v36, %s2367_s11  ;;  %v820_v59 = vrot.slane %v818_v52, 5  ;;  %v824_v54 = vrot.slane %v822_v7, 4 }
  0xe8   : > { %v3260_v49 = vpop.permute.xlu0 %1022 }
  0xe9   : > { %v3262_v31 = vpop.permute.xlu1 %1073 }
  0xea   : > { %950 = vrot.lane.b32.xlu0 %v3072_v55, %s2362_s4 }
  0xeb   : > { %968 = vrot.lane.b32.xlu1 %v3185_v34, %s2362_s4 }
  0xec   : > { %v3272_v20 = vpop.permute.xlu0 %1024 }
  0xed   : > { %v3274_v12 = vpop.permute.xlu1 %1075 }
  0xee   : > { %1238 = vrot.lane.b32.xlu0 %v3268_v13, %s2367_s11 }
  0xef   : > { %1046 = vrot.lane.b32.xlu1 %v3082_v50, %s2361_s30  ;;  %v794_v50 = vshll.u32 %v220_v6, 16 }
  0xf0   : > { %v3280_v55 = vpop.permute.xlu0 %1057 }
  0xf1   : > { %v3282_v42 = vpop.permute.xlu1 %1108  ;;  %v796_v33 = vrot.slane %v794_v50, 5 }
  0xf2   : > { %952 = vrot.lane.b32.xlu0 %v3224_v39, %s2362_s4 }
  0xf3   : > { %1048 = vrot.lane.b32.xlu1 %v3244_v36, %s2361_s30  ;;  %v797_v63 = vsel %vm2522_vm5, %v792_v23, %v796_v33 }
  0xf4   : > { %v3289_v10 = vpop.permute.xlu0 %1059 }
  0xf5   : > { %v3291_v5 = vpop.permute.xlu1 %1110 }
  0xf6   : > { %1030 = vrot.lane.b32.xlu0 %v3117_v26, %s2361_s30  ;;  %v787_v26 = vsel %vm2522_vm5, %v782_v61, %v786_v56  ;;  %v3345_v61 = vld [vmem:[%s2445_s28 + $0xd4] sm:$0x1]  ;;  %s2166_s28 = sshll.u32 %s2413_s16, 11  ;;  %s3651_s16 = scalar_lea.sflag [#allocation3], %s161_s20 }
  0xf7   : > { %1081 = vrot.lane.b32.xlu1 %v3121_v57, %s2360_s29  ;;  %v3314_v46 = vcombine.low %v787_v26, %v797_v63  ;;  %v825_v26 = vor.u32 %v824_v54, %v820_v59  ;;  %v828_v63 = vshll.u32 %v3345_v61, 16  ;;  %v840_v54 = vrot.slane %v3345_v61, 5 }
  0xf8   : > { %v3297_v17 = vpop.permute.xlu0 %1092 }
  0xf9   : > { %v1144_v28 = vpop.permute.xlu1 %1143  ;;  %v826_v58 = vrot.slane %v825_v26, 4 }
  0xfa   : > { %1032 = vrot.lane.b32.xlu0 %v3268_v13, %s2361_s30 }
  0xfb   : > { %1083 = vrot.lane.b32.xlu1 %v2072_v45, %s2360_s29 }
  0xfc   : > { %v3302_v35 = vpop.permute.xlu0 %1094 }
  0xfd   : > { %v3308_v25 = vpop.permute.xlu1 %1145 }
  0xfe   : > { %1065 = vrot.lane.b32.xlu0 %v3169_v2, %s2360_s29 }
  0xff   : > { %1116 = vrot.lane.b32.xlu1 %v3185_v34, %s2363_s5  ;;  %v809_v34 = vshrl.u32 %v3319_v53, 16 }
 0x100   : > { %v3316_v14 = vpop.permute.xlu0 %1127 }
 0x101   : > { %v1179_v3 = vpop.permute.xlu1 %1178  ;;  %v811_v56 = vrot.slane %v809_v34, 4 }
 0x102   : > { %1067 = vrot.lane.b32.xlu0 %v3046_v43, %s2360_s29  ;;  %s1938_s29 = sshll.u32 %s3546_s27, 4  ;;  %s3641_s29 = int_to_ptr.vmem [resolvable:$true] %s1938_s29 }
 0x103   : > { %1118 = vrot.lane.b32.xlu1 %v3314_v46, %s2363_s5 }
 0x104   : > { %v3330_v21 = vpop.permute.xlu0 %1129 }
 0x105   : > { %v1181_v19 = vpop.permute.xlu1 %1180 }
 0x106   : > { %1100 = vrot.lane.b32.xlu0 %v3224_v39, %s2363_s5  ;;  %v1293_v39 = vsel %vm1260_vm8, %v2598_v9, %v3171_v22  ;;  %v2075_v22 = vcombine.low %v3319_v53, %v3322_v62 }
 0x107   : > { %1151 = vrot.lane.b32.xlu1 %v3244_v36, %s2364_s6  ;;  %v815_v36 = vor.u32 %v814_v0, %v811_v56  ;;  %v1331_v23 = vsel %vm1309_vm9, %v1293_v39, %v3237_v8 }
 0x108   : > { %v1163_v6 = vpop.permute.xlu0 %1162  ;;  %v1364_v40 = vsel %vm1342_vm10, %v1331_v23, %v3262_v31  ;;  %v830_v31 = vrot.slane %v828_v63, 5 }
 0x109   : > { %v1214_v50 = vpop.permute.xlu1 %1213  ;;  %v1397_v38 = vsel %vm1375_vm11, %v1364_v40, %v3282_v42  ;;  %v816_v8 = vrot.slane %v815_v36, 4 }
 0x10a   : > { %1102 = vrot.lane.b32.xlu0 %v2610_v1, %s2363_s5  ;;  %v1430_v9 = vsel %vm1408_vm12, %v1397_v38, %v1144_v28  ;;  %v3718_v38 = vld [vmem:[#allocation5_spill] sm:$0xff]  ;;  %s3639_s5 = scalar_lea.hbm %s3695_s3, %s2166_s28 }
 0x10b   : > { %1153 = vrot.lane.b32.xlu1 %v3342_v47, %s2364_s6  ;;  %v1463_v24 = vsel %vm1441_vm13, %v1430_v9, %v1179_v3  ;;  %v821_v3 = vsel %vm2522_vm5, %v816_v8, %v820_v59 }
 0x10c   : > { %v3356_v33 = vpop.permute.xlu0 %1164  ;;  %v1496_v15 = vsel %vm1474_vm14, %v1463_v24, %v1214_v50 }
 0x10d   : > { %v1216_v18 = vpop.permute.xlu1 %1215 }
 0x10e   : > { %1135 = vrot.lane.b32.xlu0 %v3268_v13, %s2364_s6  ;;  %v1269_v13 = vsel %vm1260_vm8, %v2617_v37, %v3212_v48 }
 0x10f   : > { %1186 = vrot.lane.b32.xlu1 %v2072_v45, %s2365_s7  ;;  %v1296_v45 = vsel %vm1260_vm8, %v2686_v32, %v3218_v29  ;;  %v1315_v28 = vsel %vm1309_vm9, %v1269_v13, %v3260_v49  ;;  %v831_v32 = vsel %vm2522_vm5, %v826_v58, %v830_v31  ;;  %v837_v29 = vrot.slane %v3322_v62, 5 }
 0x110   : > { %v1198_v34 = vpop.permute.xlu0 %1197  ;;  %v1333_v37 = vsel %vm1309_vm9, %v1296_v45, %v3250_v30  ;;  %v1348_v48 = vsel %vm1342_vm10, %v1315_v28, %v3280_v55 }
 0x111   : > { %v1249_v11 = vpop.permute.xlu1 %1248  ;;  %v1366_v49 = vsel %vm1342_vm10, %v1333_v37, %v3274_v12  ;;  %v1381_v52 = vsel %vm1375_vm11, %v1348_v48, %v3297_v17  ;;  %v2076_v12 = vcombine.low %v821_v3, %v831_v32  ;;  %v2023_v17 = vrot.slane %v3319_v53, 9  ;;  %v3719_v48 = vld [vmem:[#allocation8_spill] sm:$0xff] }
 0x112   : > { %1137 = vrot.lane.b32.xlu0 %v2508_v41, %s2364_s6  ;;  %v1529_v42 = vsel %vm1507_vm15, %v1496_v15, %v1249_v11  ;;  %v1399_v30 = vsel %vm1375_vm11, %v1366_v49, %v3291_v5  ;;  %v1414_v55 = vsel %vm1408_vm12, %v1381_v52, %v3316_v14  ;;  %v839_v14 = vrot.slane %v837_v29, 4  ;;  %s2296_s6 = scalar_lea.vmem %s3641_s29, 2048 }
 0x113   : > { %1188 = vrot.lane.b32.xlu1 %v2075_v22, %s2365_s7  ;;  %2209 = vmatprep.mubr.msk.bf16.mxu1 %vm1562_vm0, %v1529_v42  ;;  %v1432_v51 = vsel %vm1408_vm12, %v1399_v30, %v3308_v25  ;;  %v1447_v62 = vsel %vm1441_vm13, %v1414_v55, %v1163_v6  ;;  %v3716_v6 = vld [vmem:[#allocation7_spill] sm:$0xff]  ;;  %p2297_p11 = scmp.ne.s32.totalorder %s3641_s29, %s2296_s6 }
 0x114   : > { %v1200_v7 = vpop.permute.xlu0 %1199  ;;  %v1465_v0 = vsel %vm1441_vm13, %v1432_v51, %v1181_v19  ;;  %v1480_v5 = vsel %vm1474_vm14, %v1447_v62, %v1198_v34 }
 0x115   : > { %v3397_v56 = vpop.permute.xlu1 %962  ;;  %p2298_p12 = pnand %p2297_p11, %p2430_p5 }
 0x116   : > { %1170 = vrot.lane.b32.xlu0 %v3046_v43, %s2365_s7  ;;  %v1498_v43 = vsel %vm1474_vm14, %v1465_v0, %v1216_v18  ;;  %v3717_v18 = vld [vmem:[#allocation6_spill] sm:$0xff]  ;;  %v3720_v0 = vld [vmem:[#allocation9_spill] sm:$0xff] }
 0x117   : > { %1221 = vrot.lane.b32.xlu1 %v3314_v46, %s2366_s8  ;;  %v1272_v46 = vsel %vm1260_vm8, %v3716_v6, %v3248_v60  ;;  %v838_v60 = vsel %vm2477_vm4, %v2023_v17, %v837_v29  ;;  %p2299_p13 = pneg %p2298_p12 }
 0x118   : > { %v1233_v59 = vpop.permute.xlu0 %1232  ;;  %v1317_v19 = vsel %vm1309_vm9, %v1272_v46, %v3272_v20 }
 0x119   : > { %v1513_v25 = vsel %vm1507_vm15, %v1480_v5, %v1233_v59  ;;  %v1251_v50 = vpop.permute.xlu1 %1250  ;;  %v1350_v61 = vsel %vm1342_vm10, %v1317_v19, %v3289_v10  ;;  %v3721_v59 = vld [vmem:[#allocation10_spill] sm:$0xff] }
 0x11a   : > { %1172 = vrot.lane.b32.xlu0 %v2457_v4, %s2365_s7  ;;  %2193 = vmatprep.mubr.msk.bf16.mxu0 %vm1562_vm0, %v1513_v25  ;;  %v1531_v53 = vsel %vm1507_vm15, %v1498_v43, %v1251_v50  ;;  %v841_v4 = vsel %vm2477_vm4, %v839_v14, %v840_v54  ;;  %v1383_v36 = vsel %vm1375_vm11, %v1350_v61, %v3302_v35  ;;  %s2369_s7 = smov [#allocation2]  }
 0x11b   : > { %1223 = vrot.lane.b32.xlu1 %v2076_v12, %s2366_s8  ;;  %2210 = vmatmul.mubr.msk.bf16.gmra.mrb[4].mxu1 %vm1562_vm0, %v1531_v53  ;;  %v1416_v20 = vsel %vm1408_vm12, %v1383_v36, %v3330_v21  ;;  %v2077_v26 = vcombine.low %v838_v60, %v841_v4 }
 0x11c   : > { %v947_v39 = vpop.permute.xlu0 %946  ;;  %v1449_v10 = vsel %vm1441_vm13, %v1416_v20, %v3356_v33 }
 0x11d   : > { %v965_v23 = vpop.permute.xlu1 %964  ;;  %v1482_v16 = vsel %vm1474_vm14, %v1449_v10, %v1200_v7  ;;  %v1299_v7 = vsel %vm1260_vm8, %v3719_v48, %v3397_v56  ;;  %v1275_v5 = vsel %vm1260_vm8, %v3720_v0, %v947_v39 }
 0x11e   : > { %1205 = vrot.lane.b32.xlu0 %v2610_v1, %s2366_s8  ;;  %v1302_v14 = vsel %vm1260_vm8, %v3721_v59, %v965_v23 }
 0x11f   : > { %1256 = vrot.lane.b32.xlu1 %v3342_v47, %s2367_s11 }
 0x120   : > { %v1235_v63 = vpop.permute.xlu0 %1234 }
 0x121   : > { %v1515_v40 = vsel %vm1507_vm15, %v1482_v16, %v1235_v63  ;;  %v1043_v35 = vpop.permute.xlu1 %1042  ;;  %v3722_v16 = vld [vmem:[#allocation11_spill] sm:$0xff] }
 0x122   : > { %1207 = vrot.lane.b32.xlu0 %v3717_v18, %s2366_s8  ;;  %2194 = vmatmul.mubr.msk.bf16.gmra.mrb[4].mxu0 %vm1562_vm0, %v1515_v40  ;;  %v1335_v32 = vsel %vm1309_vm9, %v1299_v7, %v1043_v35  ;;  %s2300_s8 = sshll.u32 %s2369_s7, 4  ;;  %s2301_s8 = int_to_ptr.vmem [resolvable:$false] %s2300_s8 }
 0x123   : > { %1258 = vrot.lane.b32.xlu1 %v2077_v26, %s2367_s11  ;;  %s2302_s9 = scalar_lea.vmem %s2301_s8, 4096  ;;  %p2303_p0 = scmp.lt.s32.totalorder %s3641_s29, %s2301_s8 }
 0x124   : > { %v949_v1 = vpop.permute.xlu0 %948  ;;  %p2304_p1 = scmp.lt.s32.totalorder %s2302_s9, %s2296_s6 }
 0x125   : > { %v1045_v21 = vpop.permute.xlu1 %1044  ;;  %v1278_v63 = vsel %vm1260_vm8, %v3722_v16, %v949_v1 }
 0x126   : > { %1240 = vrot.lane.b32.xlu0 %v2508_v41, %s2367_s11  ;;  %v1337_v43 = vsel %vm1309_vm9, %v1302_v14, %v1045_v21  ;;  %p2305_p2 = por %p2304_p1, %p2303_p0 }
 0x128   : > { %v1027_v47 = vpop.permute.xlu0 %1026  ;;  %p2306_p3 = pnand %p2305_p2, %p2299_p13 }
 0x129   : > { %v1078_v33 = vpop.permute.xlu1 %1077  ;;  %v1319_v54 = vsel %vm1309_vm9, %v1275_v5, %v1027_v47 }
 0x12a   : > { %1242 = vrot.lane.b32.xlu0 %v3718_v38, %s2367_s11  ;;  %v1368_v49 = vsel %vm1342_vm10, %v1335_v32, %v1078_v33 }
 0x12c   : > { %v1029_v9 = vpop.permute.xlu0 %1028 }
 0x12d   : > { %v1080_v22 = vpop.permute.xlu1 %1079  ;;  %v1321_v35 = vsel %vm1309_vm9, %v1278_v63, %v1029_v9 }
 0x12e   : > { %v1370_v6 = vsel %vm1342_vm10, %v1337_v43, %v1080_v22 }
 0x130   : > { %v1062_v8 = vpop.permute.xlu0 %1061 }
 0x131   : > { %v1113_v24 = vpop.permute.xlu1 %1112  ;;  %v1352_v25 = vsel %vm1342_vm10, %v1319_v54, %v1062_v8 }
 0x132   : > { %v1401_v30 = vsel %vm1375_vm11, %v1368_v49, %v1113_v24 }
 0x134   : > { %v1064_v34 = vpop.permute.xlu0 %1063 }
 0x135   : > { %v1115_v58 = vpop.permute.xlu1 %1114  ;;  %v1354_v18 = vsel %vm1342_vm10, %v1321_v35, %v1064_v34 }
 0x136   : > { %v1403_v19 = vsel %vm1375_vm11, %v1370_v6, %v1115_v58 }
 0x138   : > { %v1097_v31 = vpop.permute.xlu0 %1096 }
 0x139   : > { %v1148_v15 = vpop.permute.xlu1 %1147  ;;  %v1385_v46 = vsel %vm1375_vm11, %v1352_v25, %v1097_v31 }
 0x13a   : > { %v1434_v55 = vsel %vm1408_vm12, %v1401_v30, %v1148_v15 }
 0x13c   : > { %v1099_v11 = vpop.permute.xlu0 %1098 }
 0x13d   : > { %v1150_v13 = vpop.permute.xlu1 %1149  ;;  %v1387_v47 = vsel %vm1375_vm11, %v1354_v18, %v1099_v11 }
 0x13e   : > { %v1436_v39 = vsel %vm1408_vm12, %v1403_v19, %v1150_v13 }
 0x140   : > { %v1132_v42 = vpop.permute.xlu0 %1131 }
 0x141   : > { %v1183_v45 = vpop.permute.xlu1 %1182  ;;  %v1418_v61 = vsel %vm1408_vm12, %v1385_v46, %v1132_v42 }
 0x142   : > { %v1467_v51 = vsel %vm1441_vm13, %v1434_v55, %v1183_v45 }
 0x144   : > { %v1134_v28 = vpop.permute.xlu0 %1133 }
 0x145   : > { %v1185_v3 = vpop.permute.xlu1 %1184  ;;  %v1420_v38 = vsel %vm1408_vm12, %v1387_v47, %v1134_v28 }
 0x146   : > { %v1469_v4 = vsel %vm1441_vm13, %v1436_v39, %v1185_v3 }
 0x148   : > { %v1167_v41 = vpop.permute.xlu0 %1166 }
 0x149   : > { %v1218_v37 = vpop.permute.xlu1 %1217  ;;  %v1451_v60 = vsel %vm1441_vm13, %v1418_v61, %v1167_v41 }
 0x14a   : > { %v1500_v12 = vsel %vm1474_vm14, %v1467_v51, %v1218_v37 }
 0x14c   : > { %v1169_v29 = vpop.permute.xlu0 %1168 }
 0x14d   : > { %v1220_v52 = vpop.permute.xlu1 %1219  ;;  %v1453_v22 = vsel %vm1441_vm13, %v1420_v38, %v1169_v29 }
 0x14e   : > { %v1502_v20 = vsel %vm1474_vm14, %v1469_v4, %v1220_v52 }
 0x150   : > { %v1202_v62 = vpop.permute.xlu0 %1201 }
 0x151   : > { %v1253_v17 = vpop.permute.xlu1 %1252  ;;  %v1484_v36 = vsel %vm1474_vm14, %v1451_v60, %v1202_v62 }
 0x152   : > { %v1533_v56 = vsel %vm1507_vm15, %v1500_v12, %v1253_v17 }
 0x153   : > { %2213 = vmatprep.mubr.msk.bf16.mxu1 %vm1562_vm0, %v1533_v56 }
 0x154   : > { %v1204_v50 = vpop.permute.xlu0 %1203 }
 0x155   : > { %v967_v53 = vpop.permute.xlu1 %966  ;;  %v1486_v1 = vsel %vm1474_vm14, %v1453_v22, %v1204_v50 }
 0x156   : > { %v1305_v51 = vsel %vm1260_vm8, %v2998_v44, %v967_v53 }
 0x158   : > { %v1237_v23 = vpop.permute.xlu0 %1236 }
 0x159   : > { %v1517_v10 = vsel %vm1507_vm15, %v1484_v36, %v1237_v23  ;;  %v1255_v26 = vpop.permute.xlu1 %1254 }
 0x15a   : > { %2197 = vmatprep.mubr.msk.bf16.mxu0 %vm1562_vm0, %v1517_v10  ;;  %v1535_v40 = vsel %vm1507_vm15, %v1502_v20, %v1255_v26 }
 0x15b   : > { %2214 = vmatmul.mubr.msk.bf16.gmra.mrb[8].mxu1 %vm1562_vm0, %v1535_v40 }
 0x15c   : > { %v951_v21 = vpop.permute.xlu0 %950 }
 0x15d   : > { %v969_v33 = vpop.permute.xlu1 %968  ;;  %v1281_v6 = vsel %vm1260_vm8, %v3027_v27, %v951_v21 }
 0x15e   : > { %v1308_v56 = vsel %vm1260_vm8, %v3121_v57, %v969_v33 }
 0x160   : > { %v1239_v8 = vpop.permute.xlu0 %1238 }
 0x161   : > { %v1519_v24 = vsel %vm1507_vm15, %v1486_v1, %v1239_v8  ;;  %v1047_v58 = vpop.permute.xlu1 %1046  ;;  %v3538_v1 = vld [vmem:[%s3694_s2] ss:$0 sm:$0xff] }
 0x162   : > { %2198 = vmatmul.mubr.msk.bf16.gmra.mrb[8].mxu0 %vm1562_vm0, %v1519_v24  ;;  %v1339_v62 = vsel %vm1309_vm9, %v1305_v51, %v1047_v58 }
 0x164   : > { %v953_v9 = vpop.permute.xlu0 %952 }
 0x165   : > { %v1049_v31 = vpop.permute.xlu1 %1048  ;;  %v1284_v23 = vsel %vm1260_vm8, %v3169_v2, %v953_v9 }
 0x166   : > { %v1341_v14 = vsel %vm1309_vm9, %v1308_v56, %v1049_v31 }
 0x168   : > { %v1031_v15 = vpop.permute.xlu0 %1030 }
 0x169   : > { %v1082_v34 = vpop.permute.xlu1 %1081  ;;  %v1323_v57 = vsel %vm1309_vm9, %v1281_v6, %v1031_v15 }
 0x16a   : > { %v1372_v17 = vsel %vm1342_vm10, %v1339_v62, %v1082_v34 }
 0x16c   : > { %v1033_v13 = vpop.permute.xlu0 %1032 }
 0x16d   : > { %v1084_v42 = vpop.permute.xlu1 %1083  ;;  %v1325_v26 = vsel %vm1309_vm9, %v1284_v23, %v1033_v13 }
 0x16e   : > { %v1374_v44 = vsel %vm1342_vm10, %v1341_v14, %v1084_v42 }
 0x170   : > { %v1066_v11 = vpop.permute.xlu0 %1065 }
 0x171   : > { %v1117_v45 = vpop.permute.xlu1 %1116  ;;  %v1356_v61 = vsel %vm1342_vm10, %v1323_v57, %v1066_v11 }
 0x172   : > { %v1405_v5 = vsel %vm1375_vm11, %v1372_v17, %v1117_v45 }
 0x174   : > { %v1068_v3 = vpop.permute.xlu0 %1067 }
 0x175   : > { %v1119_v28 = vpop.permute.xlu1 %1118  ;;  %v1358_v63 = vsel %vm1342_vm10, %v1325_v26, %v1068_v3 }
 0x176   : > { %v1407_v46 = vsel %vm1375_vm11, %v1374_v44, %v1119_v28 }
 0x178   : > { %v1101_v41 = vpop.permute.xlu0 %1100 }
 0x179   : > { %v1152_v37 = vpop.permute.xlu1 %1151  ;;  %v1389_v4 = vsel %vm1375_vm11, %v1356_v61, %v1101_v41 }
 0x17a   : > { %v1438_v59 = vsel %vm1408_vm12, %v1405_v5, %v1152_v37 }
 0x17c   : > { %v1103_v48 = vpop.permute.xlu0 %1102 }
 0x17d   : > { %v1154_v7 = vpop.permute.xlu1 %1153  ;;  %v1391_v18 = vsel %vm1375_vm11, %v1358_v63, %v1103_v48 }
 0x17e   : > { %v1440_v19 = vsel %vm1408_vm12, %v1407_v46, %v1154_v7 }
 0x180   : > { %v1136_v32 = vpop.permute.xlu0 %1135 }
 0x181   : > { %v1187_v29 = vpop.permute.xlu1 %1186  ;;  %v1422_v20 = vsel %vm1408_vm12, %v1389_v4, %v1136_v32 }
 0x182   : > { %v1471_v54 = vsel %vm1441_vm13, %v1438_v59, %v1187_v29 }
 0x184   : > { %v1138_v49 = vpop.permute.xlu0 %1137 }
 0x185   : > { %v1189_v52 = vpop.permute.xlu1 %1188  ;;  %v1424_v21 = vsel %vm1408_vm12, %v1391_v18, %v1138_v49 }
 0x186   : > { %v1473_v39 = vsel %vm1441_vm13, %v1440_v19, %v1189_v52 }
 0x188   : > { %v1171_v30 = vpop.permute.xlu0 %1170 }
 0x189   : > { %v1222_v55 = vpop.permute.xlu1 %1221  ;;  %v1455_v16 = vsel %vm1441_vm13, %v1422_v20, %v1171_v30 }
 0x18a   : > { %v1504_v25 = vsel %vm1474_vm14, %v1471_v54, %v1222_v55 }
 0x18c   : > { %v1173_v12 = vpop.permute.xlu0 %1172 }
 0x18d   : > { %v1224_v0 = vpop.permute.xlu1 %1223  ;;  %v1457_v47 = vsel %vm1441_vm13, %v1424_v21, %v1173_v12 }
 0x18e   : > { %v1506_v36 = vsel %vm1474_vm14, %v1473_v39, %v1224_v0 }
 0x190   : > { %v1206_v43 = vpop.permute.xlu0 %1205 }
 0x191   : > { %v1257_v50 = vpop.permute.xlu1 %1256  ;;  %v1488_v40 = vsel %vm1474_vm14, %v1455_v16, %v1206_v43 }
 0x192   : > { %v1537_v53 = vsel %vm1507_vm15, %v1504_v25, %v1257_v50 }
 0x193   : > { %2217 = vmatprep.mubr.msk.bf16.mxu1 %vm1562_vm0, %v1537_v53 }
 0x194   : > { %v1208_v60 = vpop.permute.xlu0 %1207 }
 0x195   : > { %v1259_v27 = vpop.permute.xlu1 %1258  ;;  %v1490_v33 = vsel %vm1474_vm14, %v1457_v47, %v1208_v60 }
 0x196   : > { %v1539_v10 = vsel %vm1507_vm15, %v1506_v36, %v1259_v27 }
 0x197   : > { %2218 = vmatmul.mubr.msk.bf16.gmra.mrb[12].mxu1 %vm1562_vm0, %v1539_v10 }
 0x198   : > { %v1241_v35 = vpop.permute.xlu0 %1240 }
 0x199   : > { %v1521_v2 = vsel %vm1507_vm15, %v1488_v40, %v1241_v35 }
 0x19a   : > { %2201 = vmatprep.mubr.msk.bf16.mxu0 %vm1562_vm0, %v1521_v2 }
 0x19c   : > { %v1243_v38 = vpop.permute.xlu0 %1242 }
 0x19d   : > { %v1523_v22 = vsel %vm1507_vm15, %v1490_v33, %v1243_v38 }
 0x19e   : > { %2202 = vmatmul.mubr.msk.bf16.gmra.mrb[12].mxu0 %vm1562_vm0, %v1523_v22 }
 0x1ae   : > { %v2207_v8 = vpop.f32.mrb[0].mxu1 }
 0x1af   : > { %v1709_v24 = vadd.f32 %v2207_v8, %v3538_v1  ;;  %v1700_v58 = vpop.f32.mrb[1].mxu1 }
 0x1b0   : > { %v1701_v9 = vadd.f32 %v3538_v1, %v1700_v58  ;;  %v2208_v31 = vpop.f32.mrb[2].mxu1 }
 0x1b1   : > { %v2152_v15 = vpack.c.bf16 %v1709_v24, %v1709_v24  ;;  %v1712_v34 = vadd.f32 %v2208_v31, %v3538_v1  ;;  %v1703_v13 = vpop.f32.mrb[3].mxu1 }
 0x1b2   : > { %v2150_v42 = vpack.c.bf16 %v1701_v9, %v1701_v9  ;;  %v1704_v11 = vadd.f32 %v3538_v1, %v1703_v13 }
 0x1b3   : > { %1910 = vst.msk [vmem:[%s3546_s27 + $0x48] sm:$0xf] %vm1891_vm1, %v2152_v15  ;;  %v2153_v45 = vpack.c.bf16 %v1712_v34, %v1712_v34 }
 0x1b4   : > { %1908 = vst.msk [vmem:[%s3546_s27 + $0x40] sm:$0xf] %vm1891_vm1, %v2150_v42  ;;  %v2151_v3 = vpack.c.bf16 %v1704_v11, %v1704_v11 }
 0x1b5   : > { %v2191_v28 = vpop.f32.mrb[0].mxu0  ;;  %1911 = vst.msk [vmem:[%s3546_s27 + $0x4c] sm:$0xf] %vm1891_vm1, %v2153_v45 }
 0x1b6   : > { %v1645_v41 = vadd.f32 %v2191_v28, %v3538_v1  ;;  %v1636_v37 = vpop.f32.mrb[1].mxu0  ;;  %1909 = vst.msk [vmem:[%s3546_s27 + $0x44] sm:$0xf] %vm1891_vm1, %v2151_v3 }
 0x1b7   : > { %v1637_v48 = vadd.f32 %v3538_v1, %v1636_v37  ;;  %v2192_v7 = vpop.f32.mrb[2].mxu0 }
 0x1b8   : > { %v2136_v32 = vpack.c.bf16 %v1645_v41, %v1645_v41  ;;  %v1648_v29 = vadd.f32 %v2192_v7, %v3538_v1  ;;  %v1639_v49 = vpop.f32.mrb[3].mxu0 }
 0x1b9   : > { %v2134_v52 = vpack.c.bf16 %v1637_v48, %v1637_v48  ;;  %v1640_v30 = vadd.f32 %v3538_v1, %v1639_v49 }
 0x1ba   : > { %1894 = vst.msk [vmem:[%s3546_s27 + $0x8] sm:$0xf] %vm1891_vm1, %v2136_v32  ;;  %v2137_v55 = vpack.c.bf16 %v1648_v29, %v1648_v29 }
 0x1bb   : > { %1892 = vst.msk [vmem:[%s3546_s27] sm:$0xf] %vm1891_vm1, %v2134_v52  ;;  %v2135_v51 = vpack.c.bf16 %v1640_v30, %v1640_v30 }
 0x1bc   : > { %1895 = vst.msk [vmem:[%s3546_s27 + $0xc] sm:$0xf] %vm1891_vm1, %v2137_v55 }
 0x1bd   : > { %1893 = vst.msk [vmem:[%s3546_s27 + $0x4] sm:$0xf] %vm1891_vm1, %v2135_v51 }
 0x1ee   : > { %v2211_v62 = vpop.f32.mrb[4].mxu1 }
 0x1ef   : > { %v1725_v12 = vadd.f32 %v2211_v62, %v3538_v1  ;;  %v1716_v17 = vpop.f32.mrb[5].mxu1 }
 0x1f0   : > { %v1717_v0 = vadd.f32 %v3538_v1, %v1716_v17  ;;  %v2212_v5 = vpop.f32.mrb[6].mxu1 }
 0x1f1   : > { %v2156_v56 = vpack.c.bf16 %v1725_v12, %v1725_v12  ;;  %v1728_v59 = vadd.f32 %v2212_v5, %v3538_v1  ;;  %v1719_v14 = vpop.f32.mrb[7].mxu1 }
 0x1f2   : > { %v2154_v54 = vpack.c.bf16 %v1717_v0, %v1717_v0  ;;  %v1720_v43 = vadd.f32 %v3538_v1, %v1719_v14 }
 0x1f3   : > { %1914 = vst.msk [vmem:[%s3546_s27 + $0x58] sm:$0xf] %vm1891_vm1, %v2156_v56  ;;  %v2157_v44 = vpack.c.bf16 %v1728_v59, %v1728_v59 }
 0x1f4   : > { %1912 = vst.msk [vmem:[%s3546_s27 + $0x50] sm:$0xf] %vm1891_vm1, %v2154_v54  ;;  %v2155_v25 = vpack.c.bf16 %v1720_v43, %v1720_v43 }
 0x1f5   : > { %v2195_v50 = vpop.f32.mrb[4].mxu0  ;;  %1915 = vst.msk [vmem:[%s3546_s27 + $0x5c] sm:$0xf] %vm1891_vm1, %v2157_v44 }
 0x1f6   : > { %v1661_v6 = vadd.f32 %v2195_v50, %v3538_v1  ;;  %v1652_v46 = vpop.f32.mrb[5].mxu0  ;;  %1913 = vst.msk [vmem:[%s3546_s27 + $0x54] sm:$0xf] %vm1891_vm1, %v2155_v25 }
 0x1f7   : > { %v1653_v53 = vadd.f32 %v3538_v1, %v1652_v46  ;;  %v2196_v57 = vpop.f32.mrb[6].mxu0 }
 0x1f8   : > { %v2140_v19 = vpack.c.bf16 %v1661_v6, %v1661_v6  ;;  %v1664_v61 = vadd.f32 %v2196_v57, %v3538_v1  ;;  %v1655_v39 = vpop.f32.mrb[7].mxu0 }
 0x1f9   : > { %v2138_v60 = vpack.c.bf16 %v1653_v53, %v1653_v53  ;;  %v1656_v4 = vadd.f32 %v3538_v1, %v1655_v39 }
 0x1fa   : > { %1898 = vst.msk [vmem:[%s3546_s27 + $0x18] sm:$0xf] %vm1891_vm1, %v2140_v19  ;;  %v2141_v36 = vpack.c.bf16 %v1664_v61, %v1664_v61 }
 0x1fb   : > { %1896 = vst.msk [vmem:[%s3546_s27 + $0x10] sm:$0xf] %vm1891_vm1, %v2138_v60  ;;  %v2139_v27 = vpack.c.bf16 %v1656_v4, %v1656_v4 }
 0x1fc   : > { %1899 = vst.msk [vmem:[%s3546_s27 + $0x1c] sm:$0xf] %vm1891_vm1, %v2141_v36 }
 0x1fd   : > { %1897 = vst.msk [vmem:[%s3546_s27 + $0x14] sm:$0xf] %vm1891_vm1, %v2139_v27 }
 0x22e   : > { %v2215_v23 = vpop.f32.mrb[8].mxu1 }
 0x22f   : > { %v1741_v20 = vadd.f32 %v2215_v23, %v3538_v1  ;;  %v1732_v10 = vpop.f32.mrb[9].mxu1 }
 0x230   : > { %v1733_v26 = vadd.f32 %v3538_v1, %v1732_v10  ;;  %v2216_v16 = vpop.f32.mrb[10].mxu1 }
 0x231   : > { %v2160_v63 = vpack.c.bf16 %v1741_v20, %v1741_v20  ;;  %v1744_v40 = vadd.f32 %v2216_v16, %v3538_v1  ;;  %v1735_v35 = vpop.f32.mrb[11].mxu1 }
 0x232   : > { %v2158_v18 = vpack.c.bf16 %v1733_v26, %v1733_v26  ;;  %v1736_v2 = vadd.f32 %v3538_v1, %v1735_v35 }
 0x233   : > { %1918 = vst.msk [vmem:[%s3546_s27 + $0x68] sm:$0xf] %vm1891_vm1, %v2160_v63  ;;  %v2161_v21 = vpack.c.bf16 %v1744_v40, %v1744_v40 }
 0x234   : > { %1916 = vst.msk [vmem:[%s3546_s27 + $0x60] sm:$0xf] %vm1891_vm1, %v2158_v18  ;;  %v2159_v47 = vpack.c.bf16 %v1736_v2, %v1736_v2 }
 0x235   : > { %v2199_v33 = vpop.f32.mrb[8].mxu0  ;;  %1919 = vst.msk [vmem:[%s3546_s27 + $0x6c] sm:$0xf] %vm1891_vm1, %v2161_v21 }
 0x236   : > { %v1677_v38 = vadd.f32 %v2199_v33, %v3538_v1  ;;  %v1668_v22 = vpop.f32.mrb[9].mxu0  ;;  %1917 = vst.msk [vmem:[%s3546_s27 + $0x64] sm:$0xf] %vm1891_vm1, %v2159_v47 }
 0x237   : > { %v1669_v8 = vadd.f32 %v3538_v1, %v1668_v22  ;;  %v2200_v24 = vpop.f32.mrb[10].mxu0 }
 0x238   : > { %v2144_v58 = vpack.c.bf16 %v1677_v38, %v1677_v38  ;;  %v1680_v9 = vadd.f32 %v2200_v24, %v3538_v1  ;;  %v1671_v31 = vpop.f32.mrb[11].mxu0 }
 0x239   : > { %v2142_v15 = vpack.c.bf16 %v1669_v8, %v1669_v8  ;;  %v1672_v34 = vadd.f32 %v3538_v1, %v1671_v31 }
 0x23a   : > { %1902 = vst.msk [vmem:[%s3546_s27 + $0x28] sm:$0xf] %vm1891_vm1, %v2144_v58  ;;  %v2145_v13 = vpack.c.bf16 %v1680_v9, %v1680_v9 }
 0x23b   : > { %1900 = vst.msk [vmem:[%s3546_s27 + $0x20] sm:$0xf] %vm1891_vm1, %v2142_v15  ;;  %v2143_v42 = vpack.c.bf16 %v1672_v34, %v1672_v34 }
 0x23c   : > { %1903 = vst.msk [vmem:[%s3546_s27 + $0x2c] sm:$0xf] %vm1891_vm1, %v2145_v13 }
 0x23d   : > { %1901 = vst.msk [vmem:[%s3546_s27 + $0x24] sm:$0xf] %vm1891_vm1, %v2143_v42 }
 0x26a   : > { %v2219_v11 = vpop.f32.mrb[12].mxu1 }
 0x26b   : > { %v1757_v45 = vadd.f32 %v2219_v11, %v3538_v1  ;;  %v1748_v3 = vpop.f32.mrb[13].mxu1 }
 0x26c   : > { %v1749_v28 = vadd.f32 %v3538_v1, %v1748_v3  ;;  %v2220_v41 = vpop.f32.mrb[14].mxu1 }
 0x26d   : > { %v2164_v37 = vpack.c.bf16 %v1757_v45, %v1757_v45  ;;  %v1760_v48 = vadd.f32 %v2220_v41, %v3538_v1  ;;  %v1751_v7 = vpop.f32.mrb[15].mxu1 }
 0x26e   : > { %v2162_v32 = vpack.c.bf16 %v1749_v28, %v1749_v28  ;;  %v1752_v29 = vadd.f32 %v3538_v1, %v1751_v7 }
 0x26f   : > { %1922 = vst.msk [vmem:[%s3546_s27 + $0x78] sm:$0xf] %vm1891_vm1, %v2164_v37  ;;  %v2165_v49 = vpack.c.bf16 %v1760_v48, %v1760_v48 }
 0x270   : > { %1920 = vst.msk [vmem:[%s3546_s27 + $0x70] sm:$0xf] %vm1891_vm1, %v2162_v32  ;;  %v2163_v52 = vpack.c.bf16 %v1752_v29, %v1752_v29 }
 0x271   : > { %v2203_v30 = vpop.f32.mrb[12].mxu0  ;;  %1923 = vst.msk [vmem:[%s3546_s27 + $0x7c] sm:$0xf] %vm1891_vm1, %v2165_v49 }
 0x272   : > { %v1693_v55 = vadd.f32 %v2203_v30, %v3538_v1  ;;  %v1684_v51 = vpop.f32.mrb[13].mxu0  ;;  %1921 = vst.msk [vmem:[%s3546_s27 + $0x74] sm:$0xf] %vm1891_vm1, %v2163_v52 }
 0x273   : > { %v1685_v62 = vadd.f32 %v3538_v1, %v1684_v51  ;;  %v2204_v12 = vpop.f32.mrb[14].mxu0 }
 0x274   : > { %v2148_v17 = vpack.c.bf16 %v1693_v55, %v1693_v55  ;;  %v1696_v0 = vadd.f32 %v2204_v12, %v3538_v1  ;;  %v1687_v5 = vpop.f32.mrb[15].mxu0 }
 0x275   : > { %v2146_v56 = vpack.c.bf16 %v1685_v62, %v1685_v62  ;;  %v1688_v59 = vadd.f32 %v3538_v1, %v1687_v5 }
 0x276   : > { %1906 = vst.msk [vmem:[%s3546_s27 + $0x38] sm:$0xf] %vm1891_vm1, %v2148_v17  ;;  %v2149_v14 = vpack.c.bf16 %v1696_v0, %v1696_v0 }
 0x277   : > { %1904 = vst.msk [vmem:[%s3546_s27 + $0x30] sm:$0xf] %vm1891_vm1, %v2146_v56  ;;  %v2147_v54 = vpack.c.bf16 %v1688_v59, %v1688_v59 }
 0x278   : > { %1907 = vst.msk [vmem:[%s3546_s27 + $0x3c] sm:$0xf] %vm1891_vm1, %v2149_v14 }
 0x279   : > { %1905 = vst.msk [vmem:[%s3546_s27 + $0x34] sm:$0xf] %vm1891_vm1, %v2147_v54 }
 0x27a   : > { %2309 = shalt.err (!%p2306_p3)
}
 0x27b   : > { %s2310_s10 = scalar_lea.hbm %s3639_s5, 2048  ;;  %s2314_s19 = scalar_lea.hbm %s3695_s3, 4096 }
 0x27c   : > { %p2311_p4 = scmp.ne.s32.totalorder %s3639_s5, %s2310_s10  ;;  %p2315_p9 = scmp.lt.u32.totalorder %s3639_s5, %s3695_s3 }
 0x27d   : > { %p2316_p10 = scmp.lt.u32.totalorder %s2314_s19, %s2310_s10  ;;  %p2318_p12 = scmp.lt.u32.totalorder %s2310_s10, %s3639_s5 }
 0x27e   : > { %p2312_p7 = pnand %p2311_p4, %p2430_p5 }
 0x27f   : > { %p2317_p11 = por %p2316_p10, %p2315_p9 }
 0x280   : > { %p2313_p8 = pneg %p2312_p7 }
 0x281   : > { %p2319_p13 = por %p2318_p12, %p2317_p11 }
 0x283   : > { %p2320_p0 = pnand %p2319_p13, %p2313_p8 }
 0x285   : > { %2323 = shalt.err (!%p2320_p0)
}
 0x286   : > { %s2370_s25 = smov 64   ;;  %s2371_s26 = smov 4  }
 0x287   : > { %2226 = dma.vmem_to_hbm [thread:$0]  (%p2430_p5), %s3641_s29, 2048, %s3639_s5, %s3651_s16, %s2370_s25, %s2370_s25, %s2371_s26  }
 0x288 PF: > { %p2232_p1 = scmp.ge.s32.totalorder %s2358_s15, 2  ;;  %s1953_s27 = sand.u32 1, %s2346_s12  }
 0x289   : > { %s1954_s28 = scalar_lea.sflag [#allocation3], %s1953_s27 }
 0x28a   : > { %p2229_p2 = pnand %p2232_p1, %p2434_p6 }
 0x28c   : > { %2341 = dma.done.wait (!%p2229_p2), %s1954_s28, 2048  }
 0x28d   : > { %2343 = vsyncadd (!%p2229_p2), %s1954_s28, 4294965248  ;;  %p13_p3 = scmp.ge.s32.totalorder %s2417_s18, 4   ;;  %s3723_s12 = smov %s2350_s13 }
 0x28e   : > { %s3724_s13 = smov %s2354_s14  ;;  %s3725_s14 = smov %s2428_s21 }
 0x28f   : > { %s3726_s15 = smov %s2417_s18  ;;  %15 = sbr.rel (!%p13_p3) target bundleno = 3 (0x3), region = 67 }
 0x296   :  { %1959 = vsyncpa [#allocation3], 1 }
 0x297   :  { %1961 = vsyncpa [#allocation3 + $0x1], 1 }

</bundles_post_ra>
